<compile_context>
chip_gen: v7x
topology: tpu7x:2x2x1
jax: 0.10.0
libtpu: 0.0.40
codegen_flags: <defaults>
</compile_context>

<pallas_src>
import functools

import jax
import jax.numpy as jnp
from jax.experimental import pallas as pl
from jax.experimental.pallas import tpu as pltpu

N_IN, H1, H2, N_OUT = 12, 6, 6, 1
LANES = 128      # lane width
SUBS = 8         # sublane granularity


def ann_kernel(x_ref, w1_ref, b1_ref, w2_ref, b2_ref, w3_ref, b3_ref, o_ref):
    # x_ref: [12, R, 128] (feature, sublane-block, lane) in VMEM.
    # w*_ref / b*_ref: small (out, in) / (out,) f32 arrays in SMEM (scalar reads).
    # o_ref: [R, 128] lane-dense output block.
    x = [x_ref[k] for k in range(N_IN)]          # each [R, 128], full-density vregs

    def dense(w_ref, b_ref, inputs, n_out, relu):
        """Unrolled y_j = act(sum_k w[j,k] * x_k + b[j]) as VPU broadcast-FMAs."""
        outs = []
        n_in = len(inputs)
        for j in range(n_out):
            acc = inputs[0] * w_ref[j, 0]
            for k in range(1, n_in):
                acc = acc + inputs[k] * w_ref[j, k]
            acc = acc + b_ref[j]
            if relu:
                acc = jnp.maximum(acc, 0.0)
            outs.append(acc)
        return outs

    h1 = dense(w1_ref, b1_ref, x, H1, relu=True)        # [R,128] x 6
    h2 = dense(w2_ref, b2_ref, h1, H2, relu=True)       # [R,128] x 6
    (z,) = dense(w3_ref, b3_ref, h2, N_OUT, relu=False)  # [R,128]
    o_ref[...] = jax.nn.sigmoid(z).astype(o_ref.dtype)   # EUP sigmoid, lane-dense store


def ann_forward(x, params, tile_rows=256):
    """x: [B, 12] float32.  Returns [B, 1] (matches torch forward)."""
    w1, b1, w2, b2, w3, b3 = params
    B = x.shape[0]

    # --- choose tiling: batch -> (lane_block_rows, 128 lanes) ---
    lane_blocks = pl.cdiv(B, LANES)
    tile_rows = max(SUBS, min(tile_rows, lane_blocks))
    tile_rows = ((tile_rows + SUBS - 1) // SUBS) * SUBS      # sublane-aligned
    n_tiles = pl.cdiv(lane_blocks, tile_rows)
    padded_lane_blocks = n_tiles * tile_rows
    b_pad = padded_lane_blocks * LANES

    # --- layout plumbing: pad + transpose so batch lives on the lane axis ---
    xp = jnp.pad(x, ((0, b_pad - B), (0, 0)))                # zero-pad the tail
    xt = xp.T.reshape(N_IN, padded_lane_blocks, LANES)        # [12, R_total, 128]

    smem = pl.BlockSpec(memory_space=pltpu.MemorySpace.SMEM)  # resident scalars

    out = pl.pallas_call(
        ann_kernel,
        out_shape=jax.ShapeDtypeStruct((padded_lane_blocks, LANES), x.dtype),
        grid=(n_tiles,),
        in_specs=[
            pl.BlockSpec((N_IN, tile_rows, LANES), lambda i: (0, i, 0)),  # x tile
            smem, smem, smem, smem, smem, smem,                            # weights/biases
        ],
        out_specs=pl.BlockSpec((tile_rows, LANES), lambda i: (i, 0)),
        compiler_params=pltpu.CompilerParams(
            dimension_semantics=("parallel",),
        ),
    )(xt, w1, b1, w2, b2, w3, b3)

    # back to [B, 1]
    return out.reshape(-1)[:B][:, None]


def init_params(key):
    """Deterministic init mimicking torch.nn.Linear defaults.
    Weights stored in PyTorch orientation (out, in); biases (out,)."""
    def linear(key, fan_in, fan_out):
        kw, kb = jax.random.split(key)
        bound = 1.0 / jnp.sqrt(fan_in)
        w = jax.random.uniform(kw, (fan_out, fan_in), jnp.float32, -bound, bound)
        b = jax.random.uniform(kb, (fan_out,), jnp.float32, -bound, bound)
        return w, b

    k1, k2, k3 = jax.random.split(key, 3)
    w1, b1 = linear(k1, N_IN, H1)
    w2, b2 = linear(k2, H1, H2)
    w3, b3 = linear(k3, H2, N_OUT)
    return (w1, b1, w2, b2, w3, b3)


def ann_reference(x, params):
    w1, b1, w2, b2, w3, b3 = params
    h1 = jax.nn.relu(x @ w1.T + b1)
    h2 = jax.nn.relu(h1 @ w2.T + b2)
    return jax.nn.sigmoid(h2 @ w3.T + b3)


if __name__ == "__main__":
    key = jax.random.PRNGKey(0)
    kx, kp = jax.random.split(key)
    params = init_params(kp)

    # Small case (single tile, padded batch tail).
    x_small = jax.random.normal(kx, (8, N_IN), jnp.float32)
    out_small = jax.block_until_ready(ann_forward(x_small, params))
    ref_small = ann_reference(x_small, params)
    assert out_small.shape == (8, 1)
    assert jnp.allclose(out_small, ref_small, atol=1e-5, rtol=1e-5), "small mismatch"

    # Larger case with a multi-step grid (batch not a multiple of 128 to
    # exercise padding + tail handling). Still tiny data overall.
    batch = 2065
    x_big = jax.random.normal(kx, (batch, N_IN), jnp.float32)
    out_big = jax.block_until_ready(ann_forward(x_big, params, tile_rows=8))
    ref_big = ann_reference(x_big, params)
    assert out_big.shape == (batch, 1)
    assert jnp.allclose(out_big, ref_big, atol=1e-5, rtol=1e-5), "grid mismatch"

    print("KERNEL_OK")
</pallas_src>

<mosaic_0001>
module attributes {stable_mosaic.version = 11 : i64} {
  func.func @ann_kernel(%arg0: i32, %arg1: memref<12x8x128xf32, #tpu.memory_space<vmem>>, %arg2: memref<6x12xf32, #tpu.memory_space<smem>>, %arg3: memref<6xf32, #tpu.memory_space<smem>>, %arg4: memref<6x6xf32, #tpu.memory_space<smem>>, %arg5: memref<6xf32, #tpu.memory_space<smem>>, %arg6: memref<1x6xf32, #tpu.memory_space<smem>>, %arg7: memref<1xf32, #tpu.memory_space<smem>>, %arg8: memref<8x128xf32, #tpu.memory_space<vmem>>) attributes {dimension_semantics = [#tpu.dimension_semantics<parallel>], iteration_bounds = array<i64: 1>, scalar_prefetch = 0 : i64, scratch_operands = 0 : i64, tpu.core_type = #tpu.core_type<tc>, window_params = [{transform_indices = @transform_0, window_bounds = array<i64: 12, 8, 128>}, {transform_indices = @transform_1, window_bounds = array<i64: 6, 12>}, {transform_indices = @transform_2, window_bounds = array<i64: 6>}, {transform_indices = @transform_3, window_bounds = array<i64: 6, 6>}, {transform_indices = @transform_4, window_bounds = array<i64: 6>}, {transform_indices = @transform_5, window_bounds = array<i64: 1, 6>}, {transform_indices = @transform_6, window_bounds = array<i64: 1>}, {transform_indices = @transform_7, window_bounds = array<i64: 8, 128>}]} {
    %c0 = arith.constant 0 : index
    %c0_0 = arith.constant 0 : index
    %c0_1 = arith.constant 0 : index
    %0 = vector.load %arg1[%c0, %c0_0, %c0_1] : memref<12x8x128xf32, #tpu.memory_space<vmem>>, vector<1x8x128xf32>
    %1 = vector.shape_cast %0 : vector<1x8x128xf32> to vector<8x128xf32>
    %c1 = arith.constant 1 : index
    %c0_2 = arith.constant 0 : index
    %c0_3 = arith.constant 0 : index
    %2 = vector.load %arg1[%c1, %c0_2, %c0_3] : memref<12x8x128xf32, #tpu.memory_space<vmem>>, vector<1x8x128xf32>
    %3 = vector.shape_cast %2 : vector<1x8x128xf32> to vector<8x128xf32>
    %c2 = arith.constant 2 : index
    %c0_4 = arith.constant 0 : index
    %c0_5 = arith.constant 0 : index
    %4 = vector.load %arg1[%c2, %c0_4, %c0_5] : memref<12x8x128xf32, #tpu.memory_space<vmem>>, vector<1x8x128xf32>
    %5 = vector.shape_cast %4 : vector<1x8x128xf32> to vector<8x128xf32>
    %c3 = arith.constant 3 : index
    %c0_6 = arith.constant 0 : index
    %c0_7 = arith.constant 0 : index
    %6 = vector.load %arg1[%c3, %c0_6, %c0_7] : memref<12x8x128xf32, #tpu.memory_space<vmem>>, vector<1x8x128xf32>
    %7 = vector.shape_cast %6 : vector<1x8x128xf32> to vector<8x128xf32>
    %c4 = arith.constant 4 : index
    %c0_8 = arith.constant 0 : index
    %c0_9 = arith.constant 0 : index
    %8 = vector.load %arg1[%c4, %c0_8, %c0_9] : memref<12x8x128xf32, #tpu.memory_space<vmem>>, vector<1x8x128xf32>
    %9 = vector.shape_cast %8 : vector<1x8x128xf32> to vector<8x128xf32>
    %c5 = arith.constant 5 : index
    %c0_10 = arith.constant 0 : index
    %c0_11 = arith.constant 0 : index
    %10 = vector.load %arg1[%c5, %c0_10, %c0_11] : memref<12x8x128xf32, #tpu.memory_space<vmem>>, vector<1x8x128xf32>
    %11 = vector.shape_cast %10 : vector<1x8x128xf32> to vector<8x128xf32>
    %c6 = arith.constant 6 : index
    %c0_12 = arith.constant 0 : index
    %c0_13 = arith.constant 0 : index
    %12 = vector.load %arg1[%c6, %c0_12, %c0_13] : memref<12x8x128xf32, #tpu.memory_space<vmem>>, vector<1x8x128xf32>
    %13 = vector.shape_cast %12 : vector<1x8x128xf32> to vector<8x128xf32>
    %c7 = arith.constant 7 : index
    %c0_14 = arith.constant 0 : index
    %c0_15 = arith.constant 0 : index
    %14 = vector.load %arg1[%c7, %c0_14, %c0_15] : memref<12x8x128xf32, #tpu.memory_space<vmem>>, vector<1x8x128xf32>
    %15 = vector.shape_cast %14 : vector<1x8x128xf32> to vector<8x128xf32>
    %c8 = arith.constant 8 : index
    %c0_16 = arith.constant 0 : index
    %c0_17 = arith.constant 0 : index
    %16 = vector.load %arg1[%c8, %c0_16, %c0_17] : memref<12x8x128xf32, #tpu.memory_space<vmem>>, vector<1x8x128xf32>
    %17 = vector.shape_cast %16 : vector<1x8x128xf32> to vector<8x128xf32>
    %c9 = arith.constant 9 : index
    %c0_18 = arith.constant 0 : index
    %c0_19 = arith.constant 0 : index
    %18 = vector.load %arg1[%c9, %c0_18, %c0_19] : memref<12x8x128xf32, #tpu.memory_space<vmem>>, vector<1x8x128xf32>
    %19 = vector.shape_cast %18 : vector<1x8x128xf32> to vector<8x128xf32>
    %c10 = arith.constant 10 : index
    %c0_20 = arith.constant 0 : index
    %c0_21 = arith.constant 0 : index
    %20 = vector.load %arg1[%c10, %c0_20, %c0_21] : memref<12x8x128xf32, #tpu.memory_space<vmem>>, vector<1x8x128xf32>
    %21 = vector.shape_cast %20 : vector<1x8x128xf32> to vector<8x128xf32>
    %c11 = arith.constant 11 : index
    %c0_22 = arith.constant 0 : index
    %c0_23 = arith.constant 0 : index
    %22 = vector.load %arg1[%c11, %c0_22, %c0_23] : memref<12x8x128xf32, #tpu.memory_space<vmem>>, vector<1x8x128xf32>
    %23 = vector.shape_cast %22 : vector<1x8x128xf32> to vector<8x128xf32>
    %c0_24 = arith.constant 0 : index
    %c0_25 = arith.constant 0 : index
    %24 = memref.load %arg2[%c0_24, %c0_25] : memref<6x12xf32, #tpu.memory_space<smem>>
    %25 = vector.broadcast %24 : f32 to vector<8x128xf32>
    %26 = arith.mulf %1, %25 : vector<8x128xf32>
    %c0_26 = arith.constant 0 : index
    %c1_27 = arith.constant 1 : index
    %27 = memref.load %arg2[%c0_26, %c1_27] : memref<6x12xf32, #tpu.memory_space<smem>>
    %28 = vector.broadcast %27 : f32 to vector<8x128xf32>
    %29 = arith.mulf %3, %28 : vector<8x128xf32>
    %30 = arith.addf %26, %29 : vector<8x128xf32>
    %c0_28 = arith.constant 0 : index
    %c2_29 = arith.constant 2 : index
    %31 = memref.load %arg2[%c0_28, %c2_29] : memref<6x12xf32, #tpu.memory_space<smem>>
    %32 = vector.broadcast %31 : f32 to vector<8x128xf32>
    %33 = arith.mulf %5, %32 : vector<8x128xf32>
    %34 = arith.addf %30, %33 : vector<8x128xf32>
    %c0_30 = arith.constant 0 : index
    %c3_31 = arith.constant 3 : index
    %35 = memref.load %arg2[%c0_30, %c3_31] : memref<6x12xf32, #tpu.memory_space<smem>>
    %36 = vector.broadcast %35 : f32 to vector<8x128xf32>
    %37 = arith.mulf %7, %36 : vector<8x128xf32>
    %38 = arith.addf %34, %37 : vector<8x128xf32>
    %c0_32 = arith.constant 0 : index
    %c4_33 = arith.constant 4 : index
    %39 = memref.load %arg2[%c0_32, %c4_33] : memref<6x12xf32, #tpu.memory_space<smem>>
    %40 = vector.broadcast %39 : f32 to vector<8x128xf32>
    %41 = arith.mulf %9, %40 : vector<8x128xf32>
    %42 = arith.addf %38, %41 : vector<8x128xf32>
    %c0_34 = arith.constant 0 : index
    %c5_35 = arith.constant 5 : index
    %43 = memref.load %arg2[%c0_34, %c5_35] : memref<6x12xf32, #tpu.memory_space<smem>>
    %44 = vector.broadcast %43 : f32 to vector<8x128xf32>
    %45 = arith.mulf %11, %44 : vector<8x128xf32>
    %46 = arith.addf %42, %45 : vector<8x128xf32>
    %c0_36 = arith.constant 0 : index
    %c6_37 = arith.constant 6 : index
    %47 = memref.load %arg2[%c0_36, %c6_37] : memref<6x12xf32, #tpu.memory_space<smem>>
    %48 = vector.broadcast %47 : f32 to vector<8x128xf32>
    %49 = arith.mulf %13, %48 : vector<8x128xf32>
    %50 = arith.addf %46, %49 : vector<8x128xf32>
    %c0_38 = arith.constant 0 : index
    %c7_39 = arith.constant 7 : index
    %51 = memref.load %arg2[%c0_38, %c7_39] : memref<6x12xf32, #tpu.memory_space<smem>>
    %52 = vector.broadcast %51 : f32 to vector<8x128xf32>
    %53 = arith.mulf %15, %52 : vector<8x128xf32>
    %54 = arith.addf %50, %53 : vector<8x128xf32>
    %c0_40 = arith.constant 0 : index
    %c8_41 = arith.constant 8 : index
    %55 = memref.load %arg2[%c0_40, %c8_41] : memref<6x12xf32, #tpu.memory_space<smem>>
    %56 = vector.broadcast %55 : f32 to vector<8x128xf32>
    %57 = arith.mulf %17, %56 : vector<8x128xf32>
    %58 = arith.addf %54, %57 : vector<8x128xf32>
    %c0_42 = arith.constant 0 : index
    %c9_43 = arith.constant 9 : index
    %59 = memref.load %arg2[%c0_42, %c9_43] : memref<6x12xf32, #tpu.memory_space<smem>>
    %60 = vector.broadcast %59 : f32 to vector<8x128xf32>
    %61 = arith.mulf %19, %60 : vector<8x128xf32>
    %62 = arith.addf %58, %61 : vector<8x128xf32>
    %c0_44 = arith.constant 0 : index
    %c10_45 = arith.constant 10 : index
    %63 = memref.load %arg2[%c0_44, %c10_45] : memref<6x12xf32, #tpu.memory_space<smem>>
    %64 = vector.broadcast %63 : f32 to vector<8x128xf32>
    %65 = arith.mulf %21, %64 : vector<8x128xf32>
    %66 = arith.addf %62, %65 : vector<8x128xf32>
    %c0_46 = arith.constant 0 : index
    %c11_47 = arith.constant 11 : index
    %67 = memref.load %arg2[%c0_46, %c11_47] : memref<6x12xf32, #tpu.memory_space<smem>>
    %68 = vector.broadcast %67 : f32 to vector<8x128xf32>
    %69 = arith.mulf %23, %68 : vector<8x128xf32>
    %70 = arith.addf %66, %69 : vector<8x128xf32>
    %c0_48 = arith.constant 0 : index
    %71 = memref.load %arg3[%c0_48] : memref<6xf32, #tpu.memory_space<smem>>
    %72 = vector.broadcast %71 : f32 to vector<8x128xf32>
    %73 = arith.addf %70, %72 : vector<8x128xf32>
    %cst = arith.constant 0.000000e+00 : f32
    %74 = vector.broadcast %cst : f32 to vector<8x128xf32>
    %75 = arith.maximumf %73, %74 : vector<8x128xf32>
    %c1_49 = arith.constant 1 : index
    %c0_50 = arith.constant 0 : index
    %76 = memref.load %arg2[%c1_49, %c0_50] : memref<6x12xf32, #tpu.memory_space<smem>>
    %77 = vector.broadcast %76 : f32 to vector<8x128xf32>
    %78 = arith.mulf %1, %77 : vector<8x128xf32>
    %c1_51 = arith.constant 1 : index
    %c1_52 = arith.constant 1 : index
    %79 = memref.load %arg2[%c1_51, %c1_52] : memref<6x12xf32, #tpu.memory_space<smem>>
    %80 = vector.broadcast %79 : f32 to vector<8x128xf32>
    %81 = arith.mulf %3, %80 : vector<8x128xf32>
    %82 = arith.addf %78, %81 : vector<8x128xf32>
    %c1_53 = arith.constant 1 : index
    %c2_54 = arith.constant 2 : index
    %83 = memref.load %arg2[%c1_53, %c2_54] : memref<6x12xf32, #tpu.memory_space<smem>>
    %84 = vector.broadcast %83 : f32 to vector<8x128xf32>
    %85 = arith.mulf %5, %84 : vector<8x128xf32>
    %86 = arith.addf %82, %85 : vector<8x128xf32>
    %c1_55 = arith.constant 1 : index
    %c3_56 = arith.constant 3 : index
    %87 = memref.load %arg2[%c1_55, %c3_56] : memref<6x12xf32, #tpu.memory_space<smem>>
    %88 = vector.broadcast %87 : f32 to vector<8x128xf32>
    %89 = arith.mulf %7, %88 : vector<8x128xf32>
    %90 = arith.addf %86, %89 : vector<8x128xf32>
    %c1_57 = arith.constant 1 : index
    %c4_58 = arith.constant 4 : index
    %91 = memref.load %arg2[%c1_57, %c4_58] : memref<6x12xf32, #tpu.memory_space<smem>>
    %92 = vector.broadcast %91 : f32 to vector<8x128xf32>
    %93 = arith.mulf %9, %92 : vector<8x128xf32>
    %94 = arith.addf %90, %93 : vector<8x128xf32>
    %c1_59 = arith.constant 1 : index
    %c5_60 = arith.constant 5 : index
    %95 = memref.load %arg2[%c1_59, %c5_60] : memref<6x12xf32, #tpu.memory_space<smem>>
    %96 = vector.broadcast %95 : f32 to vector<8x128xf32>
    %97 = arith.mulf %11, %96 : vector<8x128xf32>
    %98 = arith.addf %94, %97 : vector<8x128xf32>
    %c1_61 = arith.constant 1 : index
    %c6_62 = arith.constant 6 : index
    %99 = memref.load %arg2[%c1_61, %c6_62] : memref<6x12xf32, #tpu.memory_space<smem>>
    %100 = vector.broadcast %99 : f32 to vector<8x128xf32>
    %101 = arith.mulf %13, %100 : vector<8x128xf32>
    %102 = arith.addf %98, %101 : vector<8x128xf32>
    %c1_63 = arith.constant 1 : index
    %c7_64 = arith.constant 7 : index
    %103 = memref.load %arg2[%c1_63, %c7_64] : memref<6x12xf32, #tpu.memory_space<smem>>
    %104 = vector.broadcast %103 : f32 to vector<8x128xf32>
    %105 = arith.mulf %15, %104 : vector<8x128xf32>
    %106 = arith.addf %102, %105 : vector<8x128xf32>
    %c1_65 = arith.constant 1 : index
    %c8_66 = arith.constant 8 : index
    %107 = memref.load %arg2[%c1_65, %c8_66] : memref<6x12xf32, #tpu.memory_space<smem>>
    %108 = vector.broadcast %107 : f32 to vector<8x128xf32>
    %109 = arith.mulf %17, %108 : vector<8x128xf32>
    %110 = arith.addf %106, %109 : vector<8x128xf32>
    %c1_67 = arith.constant 1 : index
    %c9_68 = arith.constant 9 : index
    %111 = memref.load %arg2[%c1_67, %c9_68] : memref<6x12xf32, #tpu.memory_space<smem>>
    %112 = vector.broadcast %111 : f32 to vector<8x128xf32>
    %113 = arith.mulf %19, %112 : vector<8x128xf32>
    %114 = arith.addf %110, %113 : vector<8x128xf32>
    %c1_69 = arith.constant 1 : index
    %c10_70 = arith.constant 10 : index
    %115 = memref.load %arg2[%c1_69, %c10_70] : memref<6x12xf32, #tpu.memory_space<smem>>
    %116 = vector.broadcast %115 : f32 to vector<8x128xf32>
    %117 = arith.mulf %21, %116 : vector<8x128xf32>
    %118 = arith.addf %114, %117 : vector<8x128xf32>
    %c1_71 = arith.constant 1 : index
    %c11_72 = arith.constant 11 : index
    %119 = memref.load %arg2[%c1_71, %c11_72] : memref<6x12xf32, #tpu.memory_space<smem>>
    %120 = vector.broadcast %119 : f32 to vector<8x128xf32>
    %121 = arith.mulf %23, %120 : vector<8x128xf32>
    %122 = arith.addf %118, %121 : vector<8x128xf32>
    %c1_73 = arith.constant 1 : index
    %123 = memref.load %arg3[%c1_73] : memref<6xf32, #tpu.memory_space<smem>>
    %124 = vector.broadcast %123 : f32 to vector<8x128xf32>
    %125 = arith.addf %122, %124 : vector<8x128xf32>
    %cst_74 = arith.constant 0.000000e+00 : f32
    %126 = vector.broadcast %cst_74 : f32 to vector<8x128xf32>
    %127 = arith.maximumf %125, %126 : vector<8x128xf32>
    %c2_75 = arith.constant 2 : index
    %c0_76 = arith.constant 0 : index
    %128 = memref.load %arg2[%c2_75, %c0_76] : memref<6x12xf32, #tpu.memory_space<smem>>
    %129 = vector.broadcast %128 : f32 to vector<8x128xf32>
    %130 = arith.mulf %1, %129 : vector<8x128xf32>
    %c2_77 = arith.constant 2 : index
    %c1_78 = arith.constant 1 : index
    %131 = memref.load %arg2[%c2_77, %c1_78] : memref<6x12xf32, #tpu.memory_space<smem>>
    %132 = vector.broadcast %131 : f32 to vector<8x128xf32>
    %133 = arith.mulf %3, %132 : vector<8x128xf32>
    %134 = arith.addf %130, %133 : vector<8x128xf32>
    %c2_79 = arith.constant 2 : index
    %c2_80 = arith.constant 2 : index
    %135 = memref.load %arg2[%c2_79, %c2_80] : memref<6x12xf32, #tpu.memory_space<smem>>
    %136 = vector.broadcast %135 : f32 to vector<8x128xf32>
    %137 = arith.mulf %5, %136 : vector<8x128xf32>
    %138 = arith.addf %134, %137 : vector<8x128xf32>
    %c2_81 = arith.constant 2 : index
    %c3_82 = arith.constant 3 : index
    %139 = memref.load %arg2[%c2_81, %c3_82] : memref<6x12xf32, #tpu.memory_space<smem>>
    %140 = vector.broadcast %139 : f32 to vector<8x128xf32>
    %141 = arith.mulf %7, %140 : vector<8x128xf32>
    %142 = arith.addf %138, %141 : vector<8x128xf32>
    %c2_83 = arith.constant 2 : index
    %c4_84 = arith.constant 4 : index
    %143 = memref.load %arg2[%c2_83, %c4_84] : memref<6x12xf32, #tpu.memory_space<smem>>
    %144 = vector.broadcast %143 : f32 to vector<8x128xf32>
    %145 = arith.mulf %9, %144 : vector<8x128xf32>
    %146 = arith.addf %142, %145 : vector<8x128xf32>
    %c2_85 = arith.constant 2 : index
    %c5_86 = arith.constant 5 : index
    %147 = memref.load %arg2[%c2_85, %c5_86] : memref<6x12xf32, #tpu.memory_space<smem>>
    %148 = vector.broadcast %147 : f32 to vector<8x128xf32>
    %149 = arith.mulf %11, %148 : vector<8x128xf32>
    %150 = arith.addf %146, %149 : vector<8x128xf32>
    %c2_87 = arith.constant 2 : index
    %c6_88 = arith.constant 6 : index
    %151 = memref.load %arg2[%c2_87, %c6_88] : memref<6x12xf32, #tpu.memory_space<smem>>
    %152 = vector.broadcast %151 : f32 to vector<8x128xf32>
    %153 = arith.mulf %13, %152 : vector<8x128xf32>
    %154 = arith.addf %150, %153 : vector<8x128xf32>
    %c2_89 = arith.constant 2 : index
    %c7_90 = arith.constant 7 : index
    %155 = memref.load %arg2[%c2_89, %c7_90] : memref<6x12xf32, #tpu.memory_space<smem>>
    %156 = vector.broadcast %155 : f32 to vector<8x128xf32>
    %157 = arith.mulf %15, %156 : vector<8x128xf32>
    %158 = arith.addf %154, %157 : vector<8x128xf32>
    %c2_91 = arith.constant 2 : index
    %c8_92 = arith.constant 8 : index
    %159 = memref.load %arg2[%c2_91, %c8_92] : memref<6x12xf32, #tpu.memory_space<smem>>
    %160 = vector.broadcast %159 : f32 to vector<8x128xf32>
    %161 = arith.mulf %17, %160 : vector<8x128xf32>
    %162 = arith.addf %158, %161 : vector<8x128xf32>
    %c2_93 = arith.constant 2 : index
    %c9_94 = arith.constant 9 : index
    %163 = memref.load %arg2[%c2_93, %c9_94] : memref<6x12xf32, #tpu.memory_space<smem>>
    %164 = vector.broadcast %163 : f32 to vector<8x128xf32>
    %165 = arith.mulf %19, %164 : vector<8x128xf32>
    %166 = arith.addf %162, %165 : vector<8x128xf32>
    %c2_95 = arith.constant 2 : index
    %c10_96 = arith.constant 10 : index
    %167 = memref.load %arg2[%c2_95, %c10_96] : memref<6x12xf32, #tpu.memory_space<smem>>
    %168 = vector.broadcast %167 : f32 to vector<8x128xf32>
    %169 = arith.mulf %21, %168 : vector<8x128xf32>
    %170 = arith.addf %166, %169 : vector<8x128xf32>
    %c2_97 = arith.constant 2 : index
    %c11_98 = arith.constant 11 : index
    %171 = memref.load %arg2[%c2_97, %c11_98] : memref<6x12xf32, #tpu.memory_space<smem>>
    %172 = vector.broadcast %171 : f32 to vector<8x128xf32>
    %173 = arith.mulf %23, %172 : vector<8x128xf32>
    %174 = arith.addf %170, %173 : vector<8x128xf32>
    %c2_99 = arith.constant 2 : index
    %175 = memref.load %arg3[%c2_99] : memref<6xf32, #tpu.memory_space<smem>>
    %176 = vector.broadcast %175 : f32 to vector<8x128xf32>
    %177 = arith.addf %174, %176 : vector<8x128xf32>
    %cst_100 = arith.constant 0.000000e+00 : f32
    %178 = vector.broadcast %cst_100 : f32 to vector<8x128xf32>
    %179 = arith.maximumf %177, %178 : vector<8x128xf32>
    %c3_101 = arith.constant 3 : index
    %c0_102 = arith.constant 0 : index
    %180 = memref.load %arg2[%c3_101, %c0_102] : memref<6x12xf32, #tpu.memory_space<smem>>
    %181 = vector.broadcast %180 : f32 to vector<8x128xf32>
    %182 = arith.mulf %1, %181 : vector<8x128xf32>
    %c3_103 = arith.constant 3 : index
    %c1_104 = arith.constant 1 : index
    %183 = memref.load %arg2[%c3_103, %c1_104] : memref<6x12xf32, #tpu.memory_space<smem>>
    %184 = vector.broadcast %183 : f32 to vector<8x128xf32>
    %185 = arith.mulf %3, %184 : vector<8x128xf32>
    %186 = arith.addf %182, %185 : vector<8x128xf32>
    %c3_105 = arith.constant 3 : index
    %c2_106 = arith.constant 2 : index
    %187 = memref.load %arg2[%c3_105, %c2_106] : memref<6x12xf32, #tpu.memory_space<smem>>
    %188 = vector.broadcast %187 : f32 to vector<8x128xf32>
    %189 = arith.mulf %5, %188 : vector<8x128xf32>
    %190 = arith.addf %186, %189 : vector<8x128xf32>
    %c3_107 = arith.constant 3 : index
    %c3_108 = arith.constant 3 : index
    %191 = memref.load %arg2[%c3_107, %c3_108] : memref<6x12xf32, #tpu.memory_space<smem>>
    %192 = vector.broadcast %191 : f32 to vector<8x128xf32>
    %193 = arith.mulf %7, %192 : vector<8x128xf32>
    %194 = arith.addf %190, %193 : vector<8x128xf32>
    %c3_109 = arith.constant 3 : index
    %c4_110 = arith.constant 4 : index
    %195 = memref.load %arg2[%c3_109, %c4_110] : memref<6x12xf32, #tpu.memory_space<smem>>
    %196 = vector.broadcast %195 : f32 to vector<8x128xf32>
    %197 = arith.mulf %9, %196 : vector<8x128xf32>
    %198 = arith.addf %194, %197 : vector<8x128xf32>
    %c3_111 = arith.constant 3 : index
    %c5_112 = arith.constant 5 : index
    %199 = memref.load %arg2[%c3_111, %c5_112] : memref<6x12xf32, #tpu.memory_space<smem>>
    %200 = vector.broadcast %199 : f32 to vector<8x128xf32>
    %201 = arith.mulf %11, %200 : vector<8x128xf32>
    %202 = arith.addf %198, %201 : vector<8x128xf32>
    %c3_113 = arith.constant 3 : index
    %c6_114 = arith.constant 6 : index
    %203 = memref.load %arg2[%c3_113, %c6_114] : memref<6x12xf32, #tpu.memory_space<smem>>
    %204 = vector.broadcast %203 : f32 to vector<8x128xf32>
    %205 = arith.mulf %13, %204 : vector<8x128xf32>
    %206 = arith.addf %202, %205 : vector<8x128xf32>
    %c3_115 = arith.constant 3 : index
    %c7_116 = arith.constant 7 : index
    %207 = memref.load %arg2[%c3_115, %c7_116] : memref<6x12xf32, #tpu.memory_space<smem>>
    %208 = vector.broadcast %207 : f32 to vector<8x128xf32>
    %209 = arith.mulf %15, %208 : vector<8x128xf32>
    %210 = arith.addf %206, %209 : vector<8x128xf32>
    %c3_117 = arith.constant 3 : index
    %c8_118 = arith.constant 8 : index
    %211 = memref.load %arg2[%c3_117, %c8_118] : memref<6x12xf32, #tpu.memory_space<smem>>
    %212 = vector.broadcast %211 : f32 to vector<8x128xf32>
    %213 = arith.mulf %17, %212 : vector<8x128xf32>
    %214 = arith.addf %210, %213 : vector<8x128xf32>
    %c3_119 = arith.constant 3 : index
    %c9_120 = arith.constant 9 : index
    %215 = memref.load %arg2[%c3_119, %c9_120] : memref<6x12xf32, #tpu.memory_space<smem>>
    %216 = vector.broadcast %215 : f32 to vector<8x128xf32>
    %217 = arith.mulf %19, %216 : vector<8x128xf32>
    %218 = arith.addf %214, %217 : vector<8x128xf32>
    %c3_121 = arith.constant 3 : index
    %c10_122 = arith.constant 10 : index
    %219 = memref.load %arg2[%c3_121, %c10_122] : memref<6x12xf32, #tpu.memory_space<smem>>
    %220 = vector.broadcast %219 : f32 to vector<8x128xf32>
    %221 = arith.mulf %21, %220 : vector<8x128xf32>
    %222 = arith.addf %218, %221 : vector<8x128xf32>
    %c3_123 = arith.constant 3 : index
    %c11_124 = arith.constant 11 : index
    %223 = memref.load %arg2[%c3_123, %c11_124] : memref<6x12xf32, #tpu.memory_space<smem>>
    %224 = vector.broadcast %223 : f32 to vector<8x128xf32>
    %225 = arith.mulf %23, %224 : vector<8x128xf32>
    %226 = arith.addf %222, %225 : vector<8x128xf32>
    %c3_125 = arith.constant 3 : index
    %227 = memref.load %arg3[%c3_125] : memref<6xf32, #tpu.memory_space<smem>>
    %228 = vector.broadcast %227 : f32 to vector<8x128xf32>
    %229 = arith.addf %226, %228 : vector<8x128xf32>
    %cst_126 = arith.constant 0.000000e+00 : f32
    %230 = vector.broadcast %cst_126 : f32 to vector<8x128xf32>
    %231 = arith.maximumf %229, %230 : vector<8x128xf32>
    %c4_127 = arith.constant 4 : index
    %c0_128 = arith.constant 0 : index
    %232 = memref.load %arg2[%c4_127, %c0_128] : memref<6x12xf32, #tpu.memory_space<smem>>
    %233 = vector.broadcast %232 : f32 to vector<8x128xf32>
    %234 = arith.mulf %1, %233 : vector<8x128xf32>
    %c4_129 = arith.constant 4 : index
    %c1_130 = arith.constant 1 : index
    %235 = memref.load %arg2[%c4_129, %c1_130] : memref<6x12xf32, #tpu.memory_space<smem>>
    %236 = vector.broadcast %235 : f32 to vector<8x128xf32>
    %237 = arith.mulf %3, %236 : vector<8x128xf32>
    %238 = arith.addf %234, %237 : vector<8x128xf32>
    %c4_131 = arith.constant 4 : index
    %c2_132 = arith.constant 2 : index
    %239 = memref.load %arg2[%c4_131, %c2_132] : memref<6x12xf32, #tpu.memory_space<smem>>
    %240 = vector.broadcast %239 : f32 to vector<8x128xf32>
    %241 = arith.mulf %5, %240 : vector<8x128xf32>
    %242 = arith.addf %238, %241 : vector<8x128xf32>
    %c4_133 = arith.constant 4 : index
    %c3_134 = arith.constant 3 : index
    %243 = memref.load %arg2[%c4_133, %c3_134] : memref<6x12xf32, #tpu.memory_space<smem>>
    %244 = vector.broadcast %243 : f32 to vector<8x128xf32>
    %245 = arith.mulf %7, %244 : vector<8x128xf32>
    %246 = arith.addf %242, %245 : vector<8x128xf32>
    %c4_135 = arith.constant 4 : index
    %c4_136 = arith.constant 4 : index
    %247 = memref.load %arg2[%c4_135, %c4_136] : memref<6x12xf32, #tpu.memory_space<smem>>
    %248 = vector.broadcast %247 : f32 to vector<8x128xf32>
    %249 = arith.mulf %9, %248 : vector<8x128xf32>
    %250 = arith.addf %246, %249 : vector<8x128xf32>
    %c4_137 = arith.constant 4 : index
    %c5_138 = arith.constant 5 : index
    %251 = memref.load %arg2[%c4_137, %c5_138] : memref<6x12xf32, #tpu.memory_space<smem>>
    %252 = vector.broadcast %251 : f32 to vector<8x128xf32>
    %253 = arith.mulf %11, %252 : vector<8x128xf32>
    %254 = arith.addf %250, %253 : vector<8x128xf32>
    %c4_139 = arith.constant 4 : index
    %c6_140 = arith.constant 6 : index
    %255 = memref.load %arg2[%c4_139, %c6_140] : memref<6x12xf32, #tpu.memory_space<smem>>
    %256 = vector.broadcast %255 : f32 to vector<8x128xf32>
    %257 = arith.mulf %13, %256 : vector<8x128xf32>
    %258 = arith.addf %254, %257 : vector<8x128xf32>
    %c4_141 = arith.constant 4 : index
    %c7_142 = arith.constant 7 : index
    %259 = memref.load %arg2[%c4_141, %c7_142] : memref<6x12xf32, #tpu.memory_space<smem>>
    %260 = vector.broadcast %259 : f32 to vector<8x128xf32>
    %261 = arith.mulf %15, %260 : vector<8x128xf32>
    %262 = arith.addf %258, %261 : vector<8x128xf32>
    %c4_143 = arith.constant 4 : index
    %c8_144 = arith.constant 8 : index
    %263 = memref.load %arg2[%c4_143, %c8_144] : memref<6x12xf32, #tpu.memory_space<smem>>
    %264 = vector.broadcast %263 : f32 to vector<8x128xf32>
    %265 = arith.mulf %17, %264 : vector<8x128xf32>
    %266 = arith.addf %262, %265 : vector<8x128xf32>
    %c4_145 = arith.constant 4 : index
    %c9_146 = arith.constant 9 : index
    %267 = memref.load %arg2[%c4_145, %c9_146] : memref<6x12xf32, #tpu.memory_space<smem>>
    %268 = vector.broadcast %267 : f32 to vector<8x128xf32>
    %269 = arith.mulf %19, %268 : vector<8x128xf32>
    %270 = arith.addf %266, %269 : vector<8x128xf32>
    %c4_147 = arith.constant 4 : index
    %c10_148 = arith.constant 10 : index
    %271 = memref.load %arg2[%c4_147, %c10_148] : memref<6x12xf32, #tpu.memory_space<smem>>
    %272 = vector.broadcast %271 : f32 to vector<8x128xf32>
    %273 = arith.mulf %21, %272 : vector<8x128xf32>
    %274 = arith.addf %270, %273 : vector<8x128xf32>
    %c4_149 = arith.constant 4 : index
    %c11_150 = arith.constant 11 : index
    %275 = memref.load %arg2[%c4_149, %c11_150] : memref<6x12xf32, #tpu.memory_space<smem>>
    %276 = vector.broadcast %275 : f32 to vector<8x128xf32>
    %277 = arith.mulf %23, %276 : vector<8x128xf32>
    %278 = arith.addf %274, %277 : vector<8x128xf32>
    %c4_151 = arith.constant 4 : index
    %279 = memref.load %arg3[%c4_151] : memref<6xf32, #tpu.memory_space<smem>>
    %280 = vector.broadcast %279 : f32 to vector<8x128xf32>
    %281 = arith.addf %278, %280 : vector<8x128xf32>
    %cst_152 = arith.constant 0.000000e+00 : f32
    %282 = vector.broadcast %cst_152 : f32 to vector<8x128xf32>
    %283 = arith.maximumf %281, %282 : vector<8x128xf32>
    %c5_153 = arith.constant 5 : index
    %c0_154 = arith.constant 0 : index
    %284 = memref.load %arg2[%c5_153, %c0_154] : memref<6x12xf32, #tpu.memory_space<smem>>
    %285 = vector.broadcast %284 : f32 to vector<8x128xf32>
    %286 = arith.mulf %1, %285 : vector<8x128xf32>
    %c5_155 = arith.constant 5 : index
    %c1_156 = arith.constant 1 : index
    %287 = memref.load %arg2[%c5_155, %c1_156] : memref<6x12xf32, #tpu.memory_space<smem>>
    %288 = vector.broadcast %287 : f32 to vector<8x128xf32>
    %289 = arith.mulf %3, %288 : vector<8x128xf32>
    %290 = arith.addf %286, %289 : vector<8x128xf32>
    %c5_157 = arith.constant 5 : index
    %c2_158 = arith.constant 2 : index
    %291 = memref.load %arg2[%c5_157, %c2_158] : memref<6x12xf32, #tpu.memory_space<smem>>
    %292 = vector.broadcast %291 : f32 to vector<8x128xf32>
    %293 = arith.mulf %5, %292 : vector<8x128xf32>
    %294 = arith.addf %290, %293 : vector<8x128xf32>
    %c5_159 = arith.constant 5 : index
    %c3_160 = arith.constant 3 : index
    %295 = memref.load %arg2[%c5_159, %c3_160] : memref<6x12xf32, #tpu.memory_space<smem>>
    %296 = vector.broadcast %295 : f32 to vector<8x128xf32>
    %297 = arith.mulf %7, %296 : vector<8x128xf32>
    %298 = arith.addf %294, %297 : vector<8x128xf32>
    %c5_161 = arith.constant 5 : index
    %c4_162 = arith.constant 4 : index
    %299 = memref.load %arg2[%c5_161, %c4_162] : memref<6x12xf32, #tpu.memory_space<smem>>
    %300 = vector.broadcast %299 : f32 to vector<8x128xf32>
    %301 = arith.mulf %9, %300 : vector<8x128xf32>
    %302 = arith.addf %298, %301 : vector<8x128xf32>
    %c5_163 = arith.constant 5 : index
    %c5_164 = arith.constant 5 : index
    %303 = memref.load %arg2[%c5_163, %c5_164] : memref<6x12xf32, #tpu.memory_space<smem>>
    %304 = vector.broadcast %303 : f32 to vector<8x128xf32>
    %305 = arith.mulf %11, %304 : vector<8x128xf32>
    %306 = arith.addf %302, %305 : vector<8x128xf32>
    %c5_165 = arith.constant 5 : index
    %c6_166 = arith.constant 6 : index
    %307 = memref.load %arg2[%c5_165, %c6_166] : memref<6x12xf32, #tpu.memory_space<smem>>
    %308 = vector.broadcast %307 : f32 to vector<8x128xf32>
    %309 = arith.mulf %13, %308 : vector<8x128xf32>
    %310 = arith.addf %306, %309 : vector<8x128xf32>
    %c5_167 = arith.constant 5 : index
    %c7_168 = arith.constant 7 : index
    %311 = memref.load %arg2[%c5_167, %c7_168] : memref<6x12xf32, #tpu.memory_space<smem>>
    %312 = vector.broadcast %311 : f32 to vector<8x128xf32>
    %313 = arith.mulf %15, %312 : vector<8x128xf32>
    %314 = arith.addf %310, %313 : vector<8x128xf32>
    %c5_169 = arith.constant 5 : index
    %c8_170 = arith.constant 8 : index
    %315 = memref.load %arg2[%c5_169, %c8_170] : memref<6x12xf32, #tpu.memory_space<smem>>
    %316 = vector.broadcast %315 : f32 to vector<8x128xf32>
    %317 = arith.mulf %17, %316 : vector<8x128xf32>
    %318 = arith.addf %314, %317 : vector<8x128xf32>
    %c5_171 = arith.constant 5 : index
    %c9_172 = arith.constant 9 : index
    %319 = memref.load %arg2[%c5_171, %c9_172] : memref<6x12xf32, #tpu.memory_space<smem>>
    %320 = vector.broadcast %319 : f32 to vector<8x128xf32>
    %321 = arith.mulf %19, %320 : vector<8x128xf32>
    %322 = arith.addf %318, %321 : vector<8x128xf32>
    %c5_173 = arith.constant 5 : index
    %c10_174 = arith.constant 10 : index
    %323 = memref.load %arg2[%c5_173, %c10_174] : memref<6x12xf32, #tpu.memory_space<smem>>
    %324 = vector.broadcast %323 : f32 to vector<8x128xf32>
    %325 = arith.mulf %21, %324 : vector<8x128xf32>
    %326 = arith.addf %322, %325 : vector<8x128xf32>
    %c5_175 = arith.constant 5 : index
    %c11_176 = arith.constant 11 : index
    %327 = memref.load %arg2[%c5_175, %c11_176] : memref<6x12xf32, #tpu.memory_space<smem>>
    %328 = vector.broadcast %327 : f32 to vector<8x128xf32>
    %329 = arith.mulf %23, %328 : vector<8x128xf32>
    %330 = arith.addf %326, %329 : vector<8x128xf32>
    %c5_177 = arith.constant 5 : index
    %331 = memref.load %arg3[%c5_177] : memref<6xf32, #tpu.memory_space<smem>>
    %332 = vector.broadcast %331 : f32 to vector<8x128xf32>
    %333 = arith.addf %330, %332 : vector<8x128xf32>
    %cst_178 = arith.constant 0.000000e+00 : f32
    %334 = vector.broadcast %cst_178 : f32 to vector<8x128xf32>
    %335 = arith.maximumf %333, %334 : vector<8x128xf32>
    %c0_179 = arith.constant 0 : index
    %c0_180 = arith.constant 0 : index
    %336 = memref.load %arg4[%c0_179, %c0_180] : memref<6x6xf32, #tpu.memory_space<smem>>
    %337 = vector.broadcast %336 : f32 to vector<8x128xf32>
    %338 = arith.mulf %75, %337 : vector<8x128xf32>
    %c0_181 = arith.constant 0 : index
    %c1_182 = arith.constant 1 : index
    %339 = memref.load %arg4[%c0_181, %c1_182] : memref<6x6xf32, #tpu.memory_space<smem>>
    %340 = vector.broadcast %339 : f32 to vector<8x128xf32>
    %341 = arith.mulf %127, %340 : vector<8x128xf32>
    %342 = arith.addf %338, %341 : vector<8x128xf32>
    %c0_183 = arith.constant 0 : index
    %c2_184 = arith.constant 2 : index
    %343 = memref.load %arg4[%c0_183, %c2_184] : memref<6x6xf32, #tpu.memory_space<smem>>
    %344 = vector.broadcast %343 : f32 to vector<8x128xf32>
    %345 = arith.mulf %179, %344 : vector<8x128xf32>
    %346 = arith.addf %342, %345 : vector<8x128xf32>
    %c0_185 = arith.constant 0 : index
    %c3_186 = arith.constant 3 : index
    %347 = memref.load %arg4[%c0_185, %c3_186] : memref<6x6xf32, #tpu.memory_space<smem>>
    %348 = vector.broadcast %347 : f32 to vector<8x128xf32>
    %349 = arith.mulf %231, %348 : vector<8x128xf32>
    %350 = arith.addf %346, %349 : vector<8x128xf32>
    %c0_187 = arith.constant 0 : index
    %c4_188 = arith.constant 4 : index
    %351 = memref.load %arg4[%c0_187, %c4_188] : memref<6x6xf32, #tpu.memory_space<smem>>
    %352 = vector.broadcast %351 : f32 to vector<8x128xf32>
    %353 = arith.mulf %283, %352 : vector<8x128xf32>
    %354 = arith.addf %350, %353 : vector<8x128xf32>
    %c0_189 = arith.constant 0 : index
    %c5_190 = arith.constant 5 : index
    %355 = memref.load %arg4[%c0_189, %c5_190] : memref<6x6xf32, #tpu.memory_space<smem>>
    %356 = vector.broadcast %355 : f32 to vector<8x128xf32>
    %357 = arith.mulf %335, %356 : vector<8x128xf32>
    %358 = arith.addf %354, %357 : vector<8x128xf32>
    %c0_191 = arith.constant 0 : index
    %359 = memref.load %arg5[%c0_191] : memref<6xf32, #tpu.memory_space<smem>>
    %360 = vector.broadcast %359 : f32 to vector<8x128xf32>
    %361 = arith.addf %358, %360 : vector<8x128xf32>
    %cst_192 = arith.constant 0.000000e+00 : f32
    %362 = vector.broadcast %cst_192 : f32 to vector<8x128xf32>
    %363 = arith.maximumf %361, %362 : vector<8x128xf32>
    %c1_193 = arith.constant 1 : index
    %c0_194 = arith.constant 0 : index
    %364 = memref.load %arg4[%c1_193, %c0_194] : memref<6x6xf32, #tpu.memory_space<smem>>
    %365 = vector.broadcast %364 : f32 to vector<8x128xf32>
    %366 = arith.mulf %75, %365 : vector<8x128xf32>
    %c1_195 = arith.constant 1 : index
    %c1_196 = arith.constant 1 : index
    %367 = memref.load %arg4[%c1_195, %c1_196] : memref<6x6xf32, #tpu.memory_space<smem>>
    %368 = vector.broadcast %367 : f32 to vector<8x128xf32>
    %369 = arith.mulf %127, %368 : vector<8x128xf32>
    %370 = arith.addf %366, %369 : vector<8x128xf32>
    %c1_197 = arith.constant 1 : index
    %c2_198 = arith.constant 2 : index
    %371 = memref.load %arg4[%c1_197, %c2_198] : memref<6x6xf32, #tpu.memory_space<smem>>
    %372 = vector.broadcast %371 : f32 to vector<8x128xf32>
    %373 = arith.mulf %179, %372 : vector<8x128xf32>
    %374 = arith.addf %370, %373 : vector<8x128xf32>
    %c1_199 = arith.constant 1 : index
    %c3_200 = arith.constant 3 : index
    %375 = memref.load %arg4[%c1_199, %c3_200] : memref<6x6xf32, #tpu.memory_space<smem>>
    %376 = vector.broadcast %375 : f32 to vector<8x128xf32>
    %377 = arith.mulf %231, %376 : vector<8x128xf32>
    %378 = arith.addf %374, %377 : vector<8x128xf32>
    %c1_201 = arith.constant 1 : index
    %c4_202 = arith.constant 4 : index
    %379 = memref.load %arg4[%c1_201, %c4_202] : memref<6x6xf32, #tpu.memory_space<smem>>
    %380 = vector.broadcast %379 : f32 to vector<8x128xf32>
    %381 = arith.mulf %283, %380 : vector<8x128xf32>
    %382 = arith.addf %378, %381 : vector<8x128xf32>
    %c1_203 = arith.constant 1 : index
    %c5_204 = arith.constant 5 : index
    %383 = memref.load %arg4[%c1_203, %c5_204] : memref<6x6xf32, #tpu.memory_space<smem>>
    %384 = vector.broadcast %383 : f32 to vector<8x128xf32>
    %385 = arith.mulf %335, %384 : vector<8x128xf32>
    %386 = arith.addf %382, %385 : vector<8x128xf32>
    %c1_205 = arith.constant 1 : index
    %387 = memref.load %arg5[%c1_205] : memref<6xf32, #tpu.memory_space<smem>>
    %388 = vector.broadcast %387 : f32 to vector<8x128xf32>
    %389 = arith.addf %386, %388 : vector<8x128xf32>
    %cst_206 = arith.constant 0.000000e+00 : f32
    %390 = vector.broadcast %cst_206 : f32 to vector<8x128xf32>
    %391 = arith.maximumf %389, %390 : vector<8x128xf32>
    %c2_207 = arith.constant 2 : index
    %c0_208 = arith.constant 0 : index
    %392 = memref.load %arg4[%c2_207, %c0_208] : memref<6x6xf32, #tpu.memory_space<smem>>
    %393 = vector.broadcast %392 : f32 to vector<8x128xf32>
    %394 = arith.mulf %75, %393 : vector<8x128xf32>
    %c2_209 = arith.constant 2 : index
    %c1_210 = arith.constant 1 : index
    %395 = memref.load %arg4[%c2_209, %c1_210] : memref<6x6xf32, #tpu.memory_space<smem>>
    %396 = vector.broadcast %395 : f32 to vector<8x128xf32>
    %397 = arith.mulf %127, %396 : vector<8x128xf32>
    %398 = arith.addf %394, %397 : vector<8x128xf32>
    %c2_211 = arith.constant 2 : index
    %c2_212 = arith.constant 2 : index
    %399 = memref.load %arg4[%c2_211, %c2_212] : memref<6x6xf32, #tpu.memory_space<smem>>
    %400 = vector.broadcast %399 : f32 to vector<8x128xf32>
    %401 = arith.mulf %179, %400 : vector<8x128xf32>
    %402 = arith.addf %398, %401 : vector<8x128xf32>
    %c2_213 = arith.constant 2 : index
    %c3_214 = arith.constant 3 : index
    %403 = memref.load %arg4[%c2_213, %c3_214] : memref<6x6xf32, #tpu.memory_space<smem>>
    %404 = vector.broadcast %403 : f32 to vector<8x128xf32>
    %405 = arith.mulf %231, %404 : vector<8x128xf32>
    %406 = arith.addf %402, %405 : vector<8x128xf32>
    %c2_215 = arith.constant 2 : index
    %c4_216 = arith.constant 4 : index
    %407 = memref.load %arg4[%c2_215, %c4_216] : memref<6x6xf32, #tpu.memory_space<smem>>
    %408 = vector.broadcast %407 : f32 to vector<8x128xf32>
    %409 = arith.mulf %283, %408 : vector<8x128xf32>
    %410 = arith.addf %406, %409 : vector<8x128xf32>
    %c2_217 = arith.constant 2 : index
    %c5_218 = arith.constant 5 : index
    %411 = memref.load %arg4[%c2_217, %c5_218] : memref<6x6xf32, #tpu.memory_space<smem>>
    %412 = vector.broadcast %411 : f32 to vector<8x128xf32>
    %413 = arith.mulf %335, %412 : vector<8x128xf32>
    %414 = arith.addf %410, %413 : vector<8x128xf32>
    %c2_219 = arith.constant 2 : index
    %415 = memref.load %arg5[%c2_219] : memref<6xf32, #tpu.memory_space<smem>>
    %416 = vector.broadcast %415 : f32 to vector<8x128xf32>
    %417 = arith.addf %414, %416 : vector<8x128xf32>
    %cst_220 = arith.constant 0.000000e+00 : f32
    %418 = vector.broadcast %cst_220 : f32 to vector<8x128xf32>
    %419 = arith.maximumf %417, %418 : vector<8x128xf32>
    %c3_221 = arith.constant 3 : index
    %c0_222 = arith.constant 0 : index
    %420 = memref.load %arg4[%c3_221, %c0_222] : memref<6x6xf32, #tpu.memory_space<smem>>
    %421 = vector.broadcast %420 : f32 to vector<8x128xf32>
    %422 = arith.mulf %75, %421 : vector<8x128xf32>
    %c3_223 = arith.constant 3 : index
    %c1_224 = arith.constant 1 : index
    %423 = memref.load %arg4[%c3_223, %c1_224] : memref<6x6xf32, #tpu.memory_space<smem>>
    %424 = vector.broadcast %423 : f32 to vector<8x128xf32>
    %425 = arith.mulf %127, %424 : vector<8x128xf32>
    %426 = arith.addf %422, %425 : vector<8x128xf32>
    %c3_225 = arith.constant 3 : index
    %c2_226 = arith.constant 2 : index
    %427 = memref.load %arg4[%c3_225, %c2_226] : memref<6x6xf32, #tpu.memory_space<smem>>
    %428 = vector.broadcast %427 : f32 to vector<8x128xf32>
    %429 = arith.mulf %179, %428 : vector<8x128xf32>
    %430 = arith.addf %426, %429 : vector<8x128xf32>
    %c3_227 = arith.constant 3 : index
    %c3_228 = arith.constant 3 : index
    %431 = memref.load %arg4[%c3_227, %c3_228] : memref<6x6xf32, #tpu.memory_space<smem>>
    %432 = vector.broadcast %431 : f32 to vector<8x128xf32>
    %433 = arith.mulf %231, %432 : vector<8x128xf32>
    %434 = arith.addf %430, %433 : vector<8x128xf32>
    %c3_229 = arith.constant 3 : index
    %c4_230 = arith.constant 4 : index
    %435 = memref.load %arg4[%c3_229, %c4_230] : memref<6x6xf32, #tpu.memory_space<smem>>
    %436 = vector.broadcast %435 : f32 to vector<8x128xf32>
    %437 = arith.mulf %283, %436 : vector<8x128xf32>
    %438 = arith.addf %434, %437 : vector<8x128xf32>
    %c3_231 = arith.constant 3 : index
    %c5_232 = arith.constant 5 : index
    %439 = memref.load %arg4[%c3_231, %c5_232] : memref<6x6xf32, #tpu.memory_space<smem>>
    %440 = vector.broadcast %439 : f32 to vector<8x128xf32>
    %441 = arith.mulf %335, %440 : vector<8x128xf32>
    %442 = arith.addf %438, %441 : vector<8x128xf32>
    %c3_233 = arith.constant 3 : index
    %443 = memref.load %arg5[%c3_233] : memref<6xf32, #tpu.memory_space<smem>>
    %444 = vector.broadcast %443 : f32 to vector<8x128xf32>
    %445 = arith.addf %442, %444 : vector<8x128xf32>
    %cst_234 = arith.constant 0.000000e+00 : f32
    %446 = vector.broadcast %cst_234 : f32 to vector<8x128xf32>
    %447 = arith.maximumf %445, %446 : vector<8x128xf32>
    %c4_235 = arith.constant 4 : index
    %c0_236 = arith.constant 0 : index
    %448 = memref.load %arg4[%c4_235, %c0_236] : memref<6x6xf32, #tpu.memory_space<smem>>
    %449 = vector.broadcast %448 : f32 to vector<8x128xf32>
    %450 = arith.mulf %75, %449 : vector<8x128xf32>
    %c4_237 = arith.constant 4 : index
    %c1_238 = arith.constant 1 : index
    %451 = memref.load %arg4[%c4_237, %c1_238] : memref<6x6xf32, #tpu.memory_space<smem>>
    %452 = vector.broadcast %451 : f32 to vector<8x128xf32>
    %453 = arith.mulf %127, %452 : vector<8x128xf32>
    %454 = arith.addf %450, %453 : vector<8x128xf32>
    %c4_239 = arith.constant 4 : index
    %c2_240 = arith.constant 2 : index
    %455 = memref.load %arg4[%c4_239, %c2_240] : memref<6x6xf32, #tpu.memory_space<smem>>
    %456 = vector.broadcast %455 : f32 to vector<8x128xf32>
    %457 = arith.mulf %179, %456 : vector<8x128xf32>
    %458 = arith.addf %454, %457 : vector<8x128xf32>
    %c4_241 = arith.constant 4 : index
    %c3_242 = arith.constant 3 : index
    %459 = memref.load %arg4[%c4_241, %c3_242] : memref<6x6xf32, #tpu.memory_space<smem>>
    %460 = vector.broadcast %459 : f32 to vector<8x128xf32>
    %461 = arith.mulf %231, %460 : vector<8x128xf32>
    %462 = arith.addf %458, %461 : vector<8x128xf32>
    %c4_243 = arith.constant 4 : index
    %c4_244 = arith.constant 4 : index
    %463 = memref.load %arg4[%c4_243, %c4_244] : memref<6x6xf32, #tpu.memory_space<smem>>
    %464 = vector.broadcast %463 : f32 to vector<8x128xf32>
    %465 = arith.mulf %283, %464 : vector<8x128xf32>
    %466 = arith.addf %462, %465 : vector<8x128xf32>
    %c4_245 = arith.constant 4 : index
    %c5_246 = arith.constant 5 : index
    %467 = memref.load %arg4[%c4_245, %c5_246] : memref<6x6xf32, #tpu.memory_space<smem>>
    %468 = vector.broadcast %467 : f32 to vector<8x128xf32>
    %469 = arith.mulf %335, %468 : vector<8x128xf32>
    %470 = arith.addf %466, %469 : vector<8x128xf32>
    %c4_247 = arith.constant 4 : index
    %471 = memref.load %arg5[%c4_247] : memref<6xf32, #tpu.memory_space<smem>>
    %472 = vector.broadcast %471 : f32 to vector<8x128xf32>
    %473 = arith.addf %470, %472 : vector<8x128xf32>
    %cst_248 = arith.constant 0.000000e+00 : f32
    %474 = vector.broadcast %cst_248 : f32 to vector<8x128xf32>
    %475 = arith.maximumf %473, %474 : vector<8x128xf32>
    %c5_249 = arith.constant 5 : index
    %c0_250 = arith.constant 0 : index
    %476 = memref.load %arg4[%c5_249, %c0_250] : memref<6x6xf32, #tpu.memory_space<smem>>
    %477 = vector.broadcast %476 : f32 to vector<8x128xf32>
    %478 = arith.mulf %75, %477 : vector<8x128xf32>
    %c5_251 = arith.constant 5 : index
    %c1_252 = arith.constant 1 : index
    %479 = memref.load %arg4[%c5_251, %c1_252] : memref<6x6xf32, #tpu.memory_space<smem>>
    %480 = vector.broadcast %479 : f32 to vector<8x128xf32>
    %481 = arith.mulf %127, %480 : vector<8x128xf32>
    %482 = arith.addf %478, %481 : vector<8x128xf32>
    %c5_253 = arith.constant 5 : index
    %c2_254 = arith.constant 2 : index
    %483 = memref.load %arg4[%c5_253, %c2_254] : memref<6x6xf32, #tpu.memory_space<smem>>
    %484 = vector.broadcast %483 : f32 to vector<8x128xf32>
    %485 = arith.mulf %179, %484 : vector<8x128xf32>
    %486 = arith.addf %482, %485 : vector<8x128xf32>
    %c5_255 = arith.constant 5 : index
    %c3_256 = arith.constant 3 : index
    %487 = memref.load %arg4[%c5_255, %c3_256] : memref<6x6xf32, #tpu.memory_space<smem>>
    %488 = vector.broadcast %487 : f32 to vector<8x128xf32>
    %489 = arith.mulf %231, %488 : vector<8x128xf32>
    %490 = arith.addf %486, %489 : vector<8x128xf32>
    %c5_257 = arith.constant 5 : index
    %c4_258 = arith.constant 4 : index
    %491 = memref.load %arg4[%c5_257, %c4_258] : memref<6x6xf32, #tpu.memory_space<smem>>
    %492 = vector.broadcast %491 : f32 to vector<8x128xf32>
    %493 = arith.mulf %283, %492 : vector<8x128xf32>
    %494 = arith.addf %490, %493 : vector<8x128xf32>
    %c5_259 = arith.constant 5 : index
    %c5_260 = arith.constant 5 : index
    %495 = memref.load %arg4[%c5_259, %c5_260] : memref<6x6xf32, #tpu.memory_space<smem>>
    %496 = vector.broadcast %495 : f32 to vector<8x128xf32>
    %497 = arith.mulf %335, %496 : vector<8x128xf32>
    %498 = arith.addf %494, %497 : vector<8x128xf32>
    %c5_261 = arith.constant 5 : index
    %499 = memref.load %arg5[%c5_261] : memref<6xf32, #tpu.memory_space<smem>>
    %500 = vector.broadcast %499 : f32 to vector<8x128xf32>
    %501 = arith.addf %498, %500 : vector<8x128xf32>
    %cst_262 = arith.constant 0.000000e+00 : f32
    %502 = vector.broadcast %cst_262 : f32 to vector<8x128xf32>
    %503 = arith.maximumf %501, %502 : vector<8x128xf32>
    %c0_263 = arith.constant 0 : index
    %c0_264 = arith.constant 0 : index
    %504 = memref.load %arg6[%c0_263, %c0_264] : memref<1x6xf32, #tpu.memory_space<smem>>
    %505 = vector.broadcast %504 : f32 to vector<8x128xf32>
    %506 = arith.mulf %363, %505 : vector<8x128xf32>
    %c0_265 = arith.constant 0 : index
    %c1_266 = arith.constant 1 : index
    %507 = memref.load %arg6[%c0_265, %c1_266] : memref<1x6xf32, #tpu.memory_space<smem>>
    %508 = vector.broadcast %507 : f32 to vector<8x128xf32>
    %509 = arith.mulf %391, %508 : vector<8x128xf32>
    %510 = arith.addf %506, %509 : vector<8x128xf32>
    %c0_267 = arith.constant 0 : index
    %c2_268 = arith.constant 2 : index
    %511 = memref.load %arg6[%c0_267, %c2_268] : memref<1x6xf32, #tpu.memory_space<smem>>
    %512 = vector.broadcast %511 : f32 to vector<8x128xf32>
    %513 = arith.mulf %419, %512 : vector<8x128xf32>
    %514 = arith.addf %510, %513 : vector<8x128xf32>
    %c0_269 = arith.constant 0 : index
    %c3_270 = arith.constant 3 : index
    %515 = memref.load %arg6[%c0_269, %c3_270] : memref<1x6xf32, #tpu.memory_space<smem>>
    %516 = vector.broadcast %515 : f32 to vector<8x128xf32>
    %517 = arith.mulf %447, %516 : vector<8x128xf32>
    %518 = arith.addf %514, %517 : vector<8x128xf32>
    %c0_271 = arith.constant 0 : index
    %c4_272 = arith.constant 4 : index
    %519 = memref.load %arg6[%c0_271, %c4_272] : memref<1x6xf32, #tpu.memory_space<smem>>
    %520 = vector.broadcast %519 : f32 to vector<8x128xf32>
    %521 = arith.mulf %475, %520 : vector<8x128xf32>
    %522 = arith.addf %518, %521 : vector<8x128xf32>
    %c0_273 = arith.constant 0 : index
    %c5_274 = arith.constant 5 : index
    %523 = memref.load %arg6[%c0_273, %c5_274] : memref<1x6xf32, #tpu.memory_space<smem>>
    %524 = vector.broadcast %523 : f32 to vector<8x128xf32>
    %525 = arith.mulf %503, %524 : vector<8x128xf32>
    %526 = arith.addf %522, %525 : vector<8x128xf32>
    %c0_275 = arith.constant 0 : index
    %527 = memref.load %arg7[%c0_275] : memref<1xf32, #tpu.memory_space<smem>>
    %528 = vector.broadcast %527 : f32 to vector<8x128xf32>
    %529 = arith.addf %526, %528 : vector<8x128xf32>
    %530 = arith.negf %529 : vector<8x128xf32>
    %531 = math.exp %530 : vector<8x128xf32>
    %cst_276 = arith.constant 1.000000e+00 : f32
    %532 = vector.broadcast %cst_276 : f32 to vector<8x128xf32>
    %533 = arith.addf %532, %531 : vector<8x128xf32>
    %534 = arith.divf %532, %533 : vector<8x128xf32>
    %c0_277 = arith.constant 0 : index
    %c0_278 = arith.constant 0 : index
    %535 = vector.load %arg8[%c0_277, %c0_278] : memref<8x128xf32, #tpu.memory_space<vmem>>, vector<8x128xf32>
    tpu.vector_store %arg8[%c0_277, %c0_278], %534 {strides = array<i32>} : memref<8x128xf32, #tpu.memory_space<vmem>>, vector<8x128xf32>,
    return
  }
  func.func @transform_0(%arg0: i32) -> (i32, i32, i32) {
    %c0_i32 = arith.constant 0 : i32
    %c0_i32_0 = arith.constant 0 : i32
    %c0_i32_1 = arith.constant 0 : i32
    return %c0_i32, %arg0, %c0_i32_0 : i32, i32, i32
  }
  func.func @transform_1(%arg0: i32) -> (i32, i32) {
    %c0_i32 = arith.constant 0 : i32
    %c0_i32_0 = arith.constant 0 : i32
    %c0_i32_1 = arith.constant 0 : i32
    return %c0_i32, %c0_i32_0 : i32, i32
  }
  func.func @transform_2(%arg0: i32) -> i32 {
    %c0_i32 = arith.constant 0 : i32
    %c0_i32_0 = arith.constant 0 : i32
    return %c0_i32 : i32
  }
  func.func @transform_3(%arg0: i32) -> (i32, i32) {
    %c0_i32 = arith.constant 0 : i32
    %c0_i32_0 = arith.constant 0 : i32
    %c0_i32_1 = arith.constant 0 : i32
    return %c0_i32, %c0_i32_0 : i32, i32
  }
  func.func @transform_4(%arg0: i32) -> i32 {
    %c0_i32 = arith.constant 0 : i32
    %c0_i32_0 = arith.constant 0 : i32
    return %c0_i32 : i32
  }
  func.func @transform_5(%arg0: i32) -> (i32, i32) {
    %c0_i32 = arith.constant 0 : i32
    %c0_i32_0 = arith.constant 0 : i32
    %c0_i32_1 = arith.constant 0 : i32
    return %c0_i32, %c0_i32_0 : i32, i32
  }
  func.func @transform_6(%arg0: i32) -> i32 {
    %c0_i32 = arith.constant 0 : i32
    %c0_i32_0 = arith.constant 0 : i32
    return %c0_i32 : i32
  }
  func.func @transform_7(%arg0: i32) -> (i32, i32) {
    %c0_i32 = arith.constant 0 : i32
    %c0_i32_0 = arith.constant 0 : i32
    return %arg0, %c0_i32 : i32, i32
  }
}

</mosaic_0001>

<bundles_post_ra>
// kernel: tpu_custom_call.1
= control target key start
LH: loop header
LB: loop body
LE: loop exit
PB: predicated region body
PF: predicated region fallthrough
CT: control target
= control target key end

     0   :  { %13 = vsyncpa [#allocation4], 0  ;;  %s1548_s0 = inlined_call_operand.hbm [shape: f32[12,8,128], index: 0, kind: input, shape index: {}]   ;;  %s1549_s1 = inlined_call_operand.hbm [shape: f32[6,12], index: 1, kind: input, shape index: {}]   ;;  %s1550_s2 = inlined_call_operand.vmem [shape: f32[6], index: 2, kind: input, shape index: {}]   ;;  %s1551_s3 = inlined_call_operand.vmem [shape: f32[6,6], index: 3, kind: input, shape index: {}]   ;;  %s1552_s4 = inlined_call_operand.vmem [shape: f32[6], index: 4, kind: input, shape index: {}]   ;;  %s1553_s5 = inlined_call_operand.vmem [shape: f32[1,6], index: 5, kind: input, shape index: {}]   ;;  %s1554_s6 = inlined_call_operand.<no memory space> [shape: f32[1], index: 6, kind: input, shape index: {}]   ;;  %s1555_s7 = inlined_call_operand.hbm [shape: f32[8,128], index: 7, kind: output, shape index: {}]  }
   0x1   :  { %14 = vsyncpa [#allocation6], 0 }
   0x2   :  { %15 = vsyncpa [#allocation7], 0 }
   0x3   :  { %16 = vsyncpa [#allocation11], 0 }
   0x4   :  { %17 = vsyncpa [#allocation14], 0  ;;  %s55_s26 = sshll.u32 %s1551_s3, 4  ;;  %s56_s26 = int_to_ptr.vmem [resolvable:$true] %s55_s26 }
   0x5   :  { %18 = vsyncpa [#allocation5], 0  ;;  %s778_s27 = scalar_lea.vmem %s56_s26, 128  ;;  %p783_p1 = scmp.lt.s32.totalorder %s56_s26, %s56_s26 }
   0x6   :  { %p779_p0 = scmp.ne.s32.totalorder %s56_s26, %s778_s27  ;;  %p784_p2 = scmp.lt.s32.totalorder %s778_s27, %s778_s27 }
   0x8   :  { %p785_p3 = por %p784_p2, %p783_p1 }
   0xa   :  { %p786_p4 = pnand %p785_p3, %p779_p0 }
   0xc   :  { %789 = shalt.err (!%p786_p4)
}
   0xd   :  { %s892_s28 = smov [#allocation10]   ;;  %s893_s29 = smov [#allocation3]  }
   0xe   :  { %58 = dma.vmem_to_smem %s56_s26, 128, %s892_s28, [#allocation11]  }
   0xf   :  { %s24_s30 = sshll.u32 %s893_s29, 4  ;;  %s790_s10 = scalar_lea.hbm %s1548_s0, 1536  ;;  %s25_s30 = int_to_ptr.vmem [resolvable:$true] %s24_s30 }
  0x10   :  { %p791_p5 = scmp.ne.s32.totalorder %s1548_s0, %s790_s10  ;;  %p794_p6 = scmp.lt.u32.totalorder %s790_s10, %s1548_s0 }
  0x12   :  { %p796_p7 = pnand %p794_p6, %p791_p5 }
  0x14   :  { %799 = shalt.err (!%p796_p7)
}
  0x15   :  { %s800_s14 = scalar_lea.vmem %s25_s30, 1536  ;;  %p805_p9 = scmp.lt.s32.totalorder %s25_s30, %s25_s30 }
  0x16   :  { %p801_p8 = scmp.ne.s32.totalorder %s25_s30, %s800_s14  ;;  %p806_p10 = scmp.lt.s32.totalorder %s800_s14, %s800_s14 }
  0x18   :  { %p807_p11 = por %p806_p10, %p805_p9 }
  0x1a   :  { %p808_p12 = pnand %p807_p11, %p801_p8 }
  0x1c   :  { %811 = shalt.err (!%p808_p12)
}
  0x1d   :  { %s894_s15 = smov 128   ;;  %s895_s16 = smov 8  }
  0x1e   :  { %30 = dma.hbm_to_vmem [thread:$0]  %s1548_s0, 1536, %s25_s30, [#allocation4], %s894_s15, %s894_s15, %s895_s16  }
  0x1f   :  { %s45_s21 = sshll.u32 %s1550_s2, 4  ;;  %s812_s24 = scalar_lea.hbm %s1549_s1, 128  ;;  %s46_s21 = int_to_ptr.vmem [resolvable:$true] %s45_s21 }
  0x20   :  { %p813_p13 = scmp.ne.s32.totalorder %s1549_s1, %s812_s24  ;;  %p816_p0 = scmp.lt.u32.totalorder %s812_s24, %s1549_s1 }
  0x22   :  { %p818_p1 = pnand %p816_p0, %p813_p13 }
  0x24   :  { %821 = shalt.err (!%p818_p1)
}
  0x25   :  { %s896_s29 = smov [#allocation8]   ;;  %s822_s2 = scalar_lea.vmem %s46_s21, 16 }
  0x26   :  { %38 = dma.hbm_to_smem %s1549_s1, 128, %s896_s29, [#allocation6]  }
  0x27   :  { %p823_p2 = scmp.ne.s32.totalorder %s46_s21, %s822_s2  ;;  %p827_p3 = scmp.lt.s32.totalorder %s46_s21, %s46_s21 }
  0x28   :  { %p828_p4 = scmp.lt.s32.totalorder %s822_s2, %s822_s2 }
  0x2a   :  { %p829_p5 = por %p828_p4, %p827_p3 }
  0x2c   :  { %p830_p6 = pnand %p829_p5, %p823_p2 }
  0x2e   :  { %833 = shalt.err (!%p830_p6)
}
  0x2f   :  { %s897_s8 = smov [#allocation9]   ;;  %s65_s11 = sshll.u32 %s1552_s4, 4  ;;  %s66_s11 = int_to_ptr.vmem [resolvable:$true] %s65_s11 }
  0x30   :  { %48 = dma.vmem_to_smem %s46_s21, 16, %s897_s8, [#allocation7]  }
  0x31   :  { %s75_s13 = sshll.u32 %s1553_s5, 4  ;;  %s834_s1 = scalar_lea.vmem %s66_s11, 16  ;;  %s76_s13 = int_to_ptr.vmem [resolvable:$true] %s75_s13 }
  0x32   :  { %p835_p7 = scmp.ne.s32.totalorder %s66_s11, %s834_s1  ;;  %p839_p8 = scmp.lt.s32.totalorder %s66_s11, %s66_s11 }
  0x33   :  { %p840_p9 = scmp.lt.s32.totalorder %s834_s1, %s834_s1 }
  0x35   :  { %p841_p10 = por %p840_p9, %p839_p8 }
  0x37   :  { %p842_p11 = pnand %p841_p10, %p835_p7 }
  0x39   :  { %845 = shalt.err (!%p842_p11)
}
  0x3a   :  { %s898_s14 = smov [#allocation12]   ;;  %s846_s15 = scalar_lea.vmem %s76_s13, 16 }
  0x3b   :  { %68 = dma.vmem_to_smem %s66_s11, 16, %s898_s14, [#allocation11]  }
  0x3c   :  { %p847_p12 = scmp.ne.s32.totalorder %s76_s13, %s846_s15  ;;  %p851_p13 = scmp.lt.s32.totalorder %s76_s13, %s76_s13 }
  0x3d   :  { %p852_p0 = scmp.lt.s32.totalorder %s846_s15, %s846_s15 }
  0x3f   :  { %p853_p1 = por %p852_p0, %p851_p13 }
  0x41   :  { %p854_p2 = pnand %p853_p1, %p847_p12 }
  0x43   :  { %857 = shalt.err (!%p854_p2)
}
  0x44   :  { %s899_s4 = smov [#allocation13]  }
  0x45   :  { %78 = dma.vmem_to_smem %s76_s13, 16, %s899_s4, [#allocation14]  }
  0x46   :  { %880 = dma.done.wait [#allocation4], 1536  }
  0x47   :  { %881 = vsyncadd [#allocation4], 4294965760 }
  0x48   :  { %882 = dma.done.wait [#allocation6], 128  }
  0x49   :  { %883 = vsyncadd [#allocation6], 4294967168 }
  0x4a   :  { %884 = dma.done.wait [#allocation7], 16  }
  0x4b   :  { %885 = vsyncadd [#allocation7], 4294967280 }
  0x4c   :  { %886 = dma.done.wait [#allocation11], 144  }
  0x4d   :  { %887 = vsyncadd [#allocation11], 4294967152 }
  0x4e   :  { %888 = dma.done.wait [#allocation14], 16  }
  0x4f   :  { %889 = vsyncadd [#allocation14], 4294967280 }
  0x50   :  { %99 = sfence }
  0x51   :  { %s123_s5 = sld [smem:[#allocation8]]  ;;  %s643_s16 = sld [smem:[#allocation8 + $0x1]]  ;;  %v977_v0 = vld [vmem:[#allocation3] sm:$0xff]  ;;  %v983_v1 = vld [vmem:[#allocation3 + $0x8] sm:$0xff]  ;;  %v989_v2 = vld [vmem:[#allocation3 + $0x10] sm:$0xff] }
  0x52   :  { %s644_s17 = sld [smem:[#allocation8 + $0x2]]  ;;  %s645_s18 = sld [smem:[#allocation8 + $0x3]]  ;;  %v995_v4 = vld [vmem:[#allocation3 + $0x18] sm:$0xff]  ;;  %v1002_v7 = vld [vmem:[#allocation3 + $0x20] sm:$0xff]  ;;  %v1009_v10 = vld [vmem:[#allocation3 + $0x28] sm:$0xff] }
  0x53   :  { %s979_s19 = sld [smem:[#allocation8 + $0x4]]  ;;  %s981_s20 = sld [smem:[#allocation8 + $0x5]]  ;;  %v1011_v11 = vld [vmem:[#allocation3 + $0x30] sm:$0xff]  ;;  %v1018_v14 = vld [vmem:[#allocation3 + $0x38] sm:$0xff]  ;;  %v1020_v15 = vld [vmem:[#allocation3 + $0x40] sm:$0xff] }
  0x54   :  { %s985_s21 = sld [smem:[#allocation8 + $0x6]]  ;;  %s987_s22 = sld [smem:[#allocation8 + $0x7]]  ;;  %v1029_v20 = vld [vmem:[#allocation3 + $0x48] sm:$0xff]  ;;  %v1031_v21 = vld [vmem:[#allocation3 + $0x50] sm:$0xff]  ;;  %v1040_v25 = vld [vmem:[#allocation3 + $0x58] sm:$0xff] }
  0x55   :  { %s991_s23 = sld [smem:[#allocation8 + $0x8]]  ;;  %s993_s24 = sld [smem:[#allocation8 + $0x9]] }
  0x56   :  { %s998_s25 = sld [smem:[#allocation8 + $0xa]]  ;;  %s1000_s26 = sld [smem:[#allocation8 + $0xb]] }
  0x57   :  { %v124_v3 = vstv %s123_s5  ;;  %v127_v6 = vstv %s643_s16  ;;  %s1005_s27 = sld [smem:[#allocation9]]  ;;  %s1014_s29 = sld [smem:[#allocation8 + $0x81]] }
  0x58   :  { %v125_v5 = vmul.f32 %v124_v3, %v977_v0  ;;  %v128_v8 = vmul.f32 %v127_v6, %v983_v1  ;;  %v131_v9 = vstv %s644_s17  ;;  %s1007_s28 = sld [smem:[#allocation8 + $0x80]]  ;;  %v135_v13 = vstv %s645_s18  ;;  %s1016_s0 = sld [smem:[#allocation8 + $0x82]] }
  0x59   :  { %v132_v12 = vmul.f32 %v131_v9, %v989_v2  ;;  %v136_v17 = vmul.f32 %v135_v13, %v995_v4  ;;  %v139_v18 = vstv %s979_s19  ;;  %v143_v19 = vstv %s981_s20  ;;  %s1025_s30 = sld [smem:[#allocation8 + $0x83]]  ;;  %s1027_s2 = sld [smem:[#allocation8 + $0x84]] }
  0x5a   :  { %v129_v16 = vadd.f32 %v128_v8, %v125_v5  ;;  %v140_v22 = vmul.f32 %v139_v18, %v1002_v7  ;;  %v147_v23 = vstv %s985_s21  ;;  %v151_v24 = vstv %s987_s22  ;;  %s1036_s8 = sld [smem:[#allocation8 + $0x85]]  ;;  %s1038_s9 = sld [smem:[#allocation8 + $0x86]] }
  0x5b   :  { %v144_v27 = vmul.f32 %v143_v19, %v1009_v10  ;;  %v148_v28 = vmul.f32 %v147_v23, %v1011_v11  ;;  %v155_v29 = vstv %s991_s23  ;;  %s1045_s10 = sld [smem:[#allocation8 + $0x87]]  ;;  %s1047_s11 = sld [smem:[#allocation8 + $0x88]]  ;;  %v152_v30 = vmul.f32 %v151_v24, %v1018_v14 }
  0x5c   :  { %v133_v26 = vadd.f32 %v132_v12, %v129_v16  ;;  %v159_v31 = vstv %s993_s24  ;;  %v163_v32 = vstv %s998_s25  ;;  %v167_v33 = vstv %s1000_s26  ;;  %s1053_s3 = sld [smem:[#allocation8 + $0x89]]  ;;  %s1055_s12 = sld [smem:[#allocation8 + $0x8a]] }
  0x5d   :  { %v156_v35 = vmul.f32 %v155_v29, %v1020_v15  ;;  %v1059_v36 = vmul.f32 %v159_v31, %v1029_v20  ;;  %v1062_v37 = vmul.f32 %v163_v32, %v1031_v21  ;;  %s1064_s13 = sld [smem:[#allocation8 + $0x8b]]  ;;  %s1066_s1 = sld [smem:[#allocation9 + $0x1]]  ;;  %v1069_v38 = vmul.f32 %v167_v33, %v1040_v25 }
  0x5e   :  { %v137_v34 = vadd.f32 %v136_v17, %v133_v26  ;;  %v175_v39 = vstv %s1007_s28  ;;  %v178_v40 = vstv %s1014_s29  ;;  %v182_v41 = vstv %s1016_s0  ;;  %s1074_s14 = sld [smem:[#allocation8 + $0x100]]  ;;  %s1076_s15 = sld [smem:[#allocation8 + $0x101]] }
  0x5f   :  { %v176_v43 = vmul.f32 %v175_v39, %v977_v0  ;;  %v179_v44 = vmul.f32 %v178_v40, %v983_v1  ;;  %v183_v45 = vmul.f32 %v182_v41, %v989_v2  ;;  %s1081_s4 = sld [smem:[#allocation8 + $0x102]]  ;;  %s1083_s5 = sld [smem:[#allocation8 + $0x103]]  ;;  %v186_v46 = vstv %s1025_s30 }
  0x60   :  { %v141_v42 = vadd.f32 %v140_v22, %v137_v34  ;;  %v190_v47 = vstv %s1027_s2  ;;  %v194_v48 = vstv %s1036_s8  ;;  %v198_v49 = vstv %s1038_s9  ;;  %s1089_s16 = sld [smem:[#allocation8 + $0x104]]  ;;  %s1091_s17 = sld [smem:[#allocation8 + $0x105]] }
  0x61   :  { %v171_v51 = vstv %s1005_s27  ;;  %v180_v52 = vadd.f32 %v179_v44, %v176_v43  ;;  %v187_v53 = vmul.f32 %v186_v46, %v995_v4  ;;  %v191_v54 = vmul.f32 %v190_v47, %v1002_v7  ;;  %s1099_s18 = sld [smem:[#allocation8 + $0x106]]  ;;  %s1101_s19 = sld [smem:[#allocation8 + $0x107]] }
  0x62   :  { %v145_v50 = vadd.f32 %v144_v27, %v141_v42  ;;  %v195_v55 = vmul.f32 %v194_v48, %v1009_v10  ;;  %v202_v56 = vstv %s1045_s10  ;;  %v206_v57 = vstv %s1047_s11  ;;  %s1105_s20 = sld [smem:[#allocation8 + $0x108]]  ;;  %s1111_s21 = sld [smem:[#allocation8 + $0x109]] }
  0x63   :  { %v184_v59 = vadd.f32 %v183_v45, %v180_v52  ;;  %v199_v60 = vmul.f32 %v198_v49, %v1011_v11  ;;  %v203_v61 = vmul.f32 %v202_v56, %v1018_v14  ;;  %v207_v62 = vmul.f32 %v206_v57, %v1020_v15  ;;  %s1113_s22 = sld [smem:[#allocation8 + $0x10a]]  ;;  %s1123_s23 = sld [smem:[#allocation8 + $0x10b]] }
  0x64   :  { %v149_v58 = vadd.f32 %v148_v28, %v145_v50  ;;  %v210_v63 = vstv %s1053_s3  ;;  %v214_v3 = vstv %s1055_s12  ;;  %v218_v5 = vstv %s1064_s13  ;;  %s1125_s24 = sld [smem:[#allocation9 + $0x2]]  ;;  %s1129_s25 = sld [smem:[#allocation8 + $0x180]] }
  0x65   :  { %v188_v8 = vadd.f32 %v187_v53, %v184_v59  ;;  %v211_v9 = vmul.f32 %v210_v63, %v1029_v20  ;;  %v222_v12 = vstv %s1066_s1  ;;  %v1118_v13 = vmul.f32 %v214_v3, %v1031_v21  ;;  %s1131_s26 = sld [smem:[#allocation8 + $0x181]]  ;;  %s1137_s28 = sld [smem:[#allocation8 + $0x182]] }
  0x66   :  { %v153_v6 = vadd.f32 %v152_v30, %v149_v58  ;;  %v226_v16 = vstv %s1074_s14  ;;  %v229_v17 = vstv %s1076_s15  ;;  %v233_v18 = vstv %s1081_s4  ;;  %s1139_s29 = sld [smem:[#allocation8 + $0x183]]  ;;  %s1147_s0 = sld [smem:[#allocation8 + $0x184]] }
  0x67   :  { %v192_v22 = vadd.f32 %v191_v54, %v188_v8  ;;  %v227_v23 = vmul.f32 %v226_v16, %v977_v0  ;;  %v230_v24 = vmul.f32 %v229_v17, %v983_v1  ;;  %v234_v26 = vmul.f32 %v233_v18, %v989_v2  ;;  %s1151_s30 = sld [smem:[#allocation8 + $0x185]]  ;;  %s1157_s2 = sld [smem:[#allocation8 + $0x186]] }
  0x68   :  { %v157_v19 = vadd.f32 %v156_v35, %v153_v6  ;;  %v237_v27 = vstv %s1083_s5  ;;  %v241_v28 = vstv %s1089_s16  ;;  %v245_v29 = vstv %s1091_s17  ;;  %s1159_s8 = sld [smem:[#allocation8 + $0x187]]  ;;  %s1163_s9 = sld [smem:[#allocation8 + $0x188]] }
  0x69   :  { %v196_v31 = vadd.f32 %v195_v55, %v192_v22  ;;  %v231_v32 = vadd.f32 %v230_v24, %v227_v23  ;;  %v238_v33 = vmul.f32 %v237_v27, %v995_v4  ;;  %v219_v34 = vmul.f32 %v218_v5, %v1040_v25  ;;  %s1171_s10 = sld [smem:[#allocation8 + $0x189]]  ;;  %s1173_s11 = sld [smem:[#allocation8 + $0x18a]] }
  0x6a   :  { %v161_v30 = vadd.f32 %v1059_v36, %v157_v19  ;;  %v242_v35 = vmul.f32 %v241_v28, %v1002_v7  ;;  %v249_v39 = vstv %s1099_s18  ;;  %v253_v40 = vstv %s1101_s19  ;;  %s1182_s3 = sld [smem:[#allocation8 + $0x18b]]  ;;  %s1190_s12 = sld [smem:[#allocation8 + $0x200]] }
  0x6b   :  { %v200_v42 = vadd.f32 %v199_v60, %v196_v31  ;;  %v235_v43 = vadd.f32 %v234_v26, %v231_v32  ;;  %v246_v36 = vmul.f32 %v245_v29, %v1009_v10  ;;  %v250_v44 = vmul.f32 %v249_v39, %v1011_v11  ;;  %s1188_s27 = sld [smem:[#allocation9 + $0x3]]  ;;  %s1197_s13 = sld [smem:[#allocation8 + $0x201]] }
  0x6c   :  { %v165_v41 = vadd.f32 %v1062_v37, %v161_v30  ;;  %v257_v45 = vstv %s1105_s20  ;;  %v261_v46 = vstv %s1111_s21  ;;  %v265_v47 = vstv %s1113_s22  ;;  %s1199_s14 = sld [smem:[#allocation8 + $0x202]]  ;;  %s1204_s15 = sld [smem:[#allocation8 + $0x203]] }
  0x6d   :  { %v204_v48 = vadd.f32 %v203_v61, %v200_v42  ;;  %v239_v49 = vadd.f32 %v238_v33, %v235_v43  ;;  %v254_v50 = vmul.f32 %v253_v40, %v1018_v14  ;;  %v258_v52 = vmul.f32 %v257_v45, %v1020_v15  ;;  %s1209_s4 = sld [smem:[#allocation8 + $0x204]]  ;;  %s1211_s5 = sld [smem:[#allocation8 + $0x205]] }
  0x6e   :  { %v169_v37 = vadd.f32 %v1069_v38, %v165_v41  ;;  %v262_v53 = vmul.f32 %v261_v46, %v1029_v20  ;;  %v1168_v54 = vmul.f32 %v265_v47, %v1031_v21  ;;  %v269_v55 = vstv %s1123_s23  ;;  %s1215_s16 = sld [smem:[#allocation8 + $0x206]]  ;;  %s1220_s17 = sld [smem:[#allocation8 + $0x207]] }
  0x6f   :  { %v208_v56 = vadd.f32 %v207_v62, %v204_v48  ;;  %v243_v57 = vadd.f32 %v242_v35, %v239_v49  ;;  %v273_v58 = vstv %s1125_s24  ;;  %v277_v59 = vstv %s1129_s25  ;;  %s1222_s18 = sld [smem:[#allocation8 + $0x208]]  ;;  %s1235_s19 = sld [smem:[#allocation8 + $0x209]] }
  0x70   :  { %v172_v38 = vadd.f32 %v171_v51, %v169_v37  ;;  %v280_v60 = vstv %s1131_s26  ;;  %v284_v61 = vstv %s1137_s28  ;;  %v288_v63 = vstv %s1139_s29  ;;  %s1237_s1 = sld [smem:[#allocation8 + $0x20a]]  ;;  %s1246_s20 = sld [smem:[#allocation8 + $0x20b]] }
  0x71   :  { %v212_v3 = vadd.f32 %v211_v9, %v208_v56  ;;  %v247_v5 = vadd.f32 %v246_v36, %v243_v57  ;;  %v1185_v6 = vmul.f32 %v269_v55, %v1040_v25  ;;  %v278_v8 = vmul.f32 %v277_v59, %v977_v0  ;;  %s1248_s21 = sld [smem:[#allocation8 + $0x280]]  ;;  %s1254_s22 = sld [smem:[#allocation9 + $0x4]] }
  0x72   :  { %v1192_v51 = vmax.f32 %v172_v38, 0.0  ;;  %v281_v62 = vmul.f32 %v280_v60, %v983_v1  ;;  %v285_v16 = vmul.f32 %v284_v61, %v989_v2  ;;  %v292_v17 = vstv %s1147_s0  ;;  %s1256_s23 = sld [smem:[#allocation8 + $0x281]]  ;;  %s1263_s25 = sld [smem:[#allocation8 + $0x282]] }
  0x73   :  { %v216_v9 = vadd.f32 %v1118_v13, %v212_v3  ;;  %v251_v18 = vadd.f32 %v250_v44, %v247_v5  ;;  %v289_v19 = vmul.f32 %v288_v63, %v995_v4  ;;  %v296_v22 = vstv %s1151_s30  ;;  %s1265_s26 = sld [smem:[#allocation8 + $0x283]]  ;;  %s1270_s28 = sld [smem:[#allocation8 + $0x284]] }
  0x74   :  { %v282_v23 = vadd.f32 %v281_v62, %v278_v8  ;;  %v293_v24 = vmul.f32 %v292_v17, %v1002_v7  ;;  %v300_v26 = vstv %s1157_s2  ;;  %v304_v27 = vstv %s1159_s8  ;;  %s1275_s29 = sld [smem:[#allocation8 + $0x285]]  ;;  %s1281_s0 = sld [smem:[#allocation8 + $0x286]] }
  0x75   :  { %v220_v13 = vadd.f32 %v219_v34, %v216_v9  ;;  %v255_v28 = vadd.f32 %v254_v50, %v251_v18  ;;  %v297_v29 = vmul.f32 %v296_v22, %v1009_v10  ;;  %v301_v30 = vmul.f32 %v300_v26, %v1011_v11  ;;  %s1283_s30 = sld [smem:[#allocation8 + $0x287]]  ;;  %s1288_s24 = sld [smem:[#allocation8 + $0x288]] }
  0x76   :  { %v286_v31 = vadd.f32 %v285_v16, %v282_v23  ;;  %v308_v32 = vstv %s1163_s9  ;;  %v312_v33 = vstv %s1171_s10  ;;  %v316_v35 = vstv %s1173_s11  ;;  %s1294_s2 = sld [smem:[#allocation8 + $0x289]]  ;;  %s1296_s8 = sld [smem:[#allocation8 + $0x28a]] }
  0x77   :  { %v223_v34 = vadd.f32 %v222_v12, %v220_v13  ;;  %v259_v39 = vadd.f32 %v258_v52, %v255_v28  ;;  %v305_v40 = vmul.f32 %v304_v27, %v1018_v14  ;;  %v309_v41 = vmul.f32 %v308_v32, %v1020_v15  ;;  %s1306_s9 = sld [smem:[#allocation8 + $0x28b]]  ;;  %s1312_s10 = sld [smem:[#allocation9 + $0x5]] }
  0x78   :  { %v290_v42 = vadd.f32 %v289_v19, %v286_v31  ;;  %v1229_v43 = vmul.f32 %v312_v33, %v1029_v20  ;;  %v1232_v36 = vmul.f32 %v316_v35, %v1031_v21  ;;  %v320_v44 = vstv %s1182_s3  ;;  %s1314_s11 = sld [smem:[#allocation10]]  ;;  %s1321_s3 = sld [smem:[#allocation10 + $0x1]] }
  0x79   :  { %v1239_v12 = vmax.f32 %v223_v34, 0.0  ;;  %v263_v45 = vadd.f32 %v262_v53, %v259_v39  ;;  %v324_v46 = vstv %s1188_s27  ;;  %v328_v47 = vstv %s1190_s12  ;;  %s1323_s12 = sld [smem:[#allocation10 + $0x2]]  ;;  %s1362_s27 = sld [smem:[#allocation10 + $0x84]] }
  0x7a   :  { %v294_v37 = vadd.f32 %v293_v24, %v290_v42  ;;  %v329_v48 = vmul.f32 %v328_v47, %v977_v0  ;;  %v331_v49 = vstv %s1197_s13  ;;  %v335_v50 = vstv %s1199_s14  ;;  %s1328_s13 = sld [smem:[#allocation10 + $0x3]]  ;;  %s1333_s14 = sld [smem:[#allocation10 + $0x4]] }
  0x7b   :  { %v267_v52 = vadd.f32 %v1168_v54, %v263_v45  ;;  %v332_v55 = vmul.f32 %v331_v49, %v983_v1  ;;  %v336_v38 = vmul.f32 %v335_v50, %v989_v2  ;;  %v339_v53 = vstv %s1204_s15  ;;  %s1338_s15 = sld [smem:[#allocation10 + $0x5]] }
  0x7c   :  { %v298_v56 = vadd.f32 %v297_v29, %v294_v37  ;;  %v1259_v57 = vmul.f32 %v320_v44, %v1040_v25  ;;  %v343_v59 = vstv %s1209_s4  ;;  %v347_v60 = vstv %s1211_s5  ;;  %s1340_s4 = sld [smem:[#allocation10 + $0x80]]  ;;  %s1345_s5 = sld [smem:[#allocation10 + $0x81]] }
  0x7d   :  { %v271_v54 = vadd.f32 %v1185_v6, %v267_v52  ;;  %v333_v61 = vadd.f32 %v332_v55, %v329_v48  ;;  %v340_v63 = vmul.f32 %v339_v53, %v995_v4  ;;  %v344_v3 = vmul.f32 %v343_v59, %v1002_v7 }
  0x7e   :  { %v302_v5 = vadd.f32 %v301_v30, %v298_v56  ;;  %v351_v8 = vstv %s1215_s16  ;;  %v355_v62 = vstv %s1220_s17  ;;  %v359_v16 = vstv %s1222_s18  ;;  %s1347_s16 = sld [smem:[#allocation10 + $0x82]]  ;;  %s1353_s17 = sld [smem:[#allocation12]] }
  0x7f   :  { %v274_v17 = vadd.f32 %v273_v58, %v271_v54  ;;  %v337_v9 = vadd.f32 %v336_v38, %v333_v61  ;;  %v348_v6 = vmul.f32 %v347_v60, %v1009_v10  ;;  %v352_v18 = vmul.f32 %v351_v8, %v1011_v11  ;;  %s1360_s18 = sld [smem:[#allocation10 + $0x83]] }
  0x80   :  { %v306_v19 = vadd.f32 %v305_v40, %v302_v5  ;;  %v356_v22 = vmul.f32 %v355_v62, %v1018_v14  ;;  %v363_v23 = vstv %s1235_s19  ;;  %v367_v24 = vstv %s1237_s1  ;;  %s1368_s19 = sld [smem:[#allocation10 + $0x85]]  ;;  %s1373_s1 = sld [smem:[#allocation10 + $0x100]] }
  0x81   :  { %v1290_v58 = vmax.f32 %v274_v17, 0.0  ;;  %v341_v26 = vadd.f32 %v340_v63, %v337_v9  ;;  %v360_v27 = vmul.f32 %v359_v16, %v1020_v15  ;;  %v364_v13 = vmul.f32 %v363_v23, %v1029_v20 }
  0x82   :  { %v310_v28 = vadd.f32 %v309_v41, %v306_v19  ;;  %v1299_v29 = vmul.f32 %v367_v24, %v1031_v21  ;;  %v371_v30 = vstv %s1246_s20  ;;  %v379_v31 = vstv %s1248_s21  ;;  %s1375_s20 = sld [smem:[#allocation10 + $0x101]]  ;;  %s1384_s21 = sld [smem:[#allocation10 + $0x102]] }
  0x83   :  { %v345_v32 = vadd.f32 %v344_v3, %v341_v26  ;;  %v375_v33 = vstv %s1254_s22  ;;  %v380_v35 = vmul.f32 %v379_v31, %v977_v0  ;;  %v382_v34 = vstv %s1256_s23  ;;  %s1386_s23 = sld [smem:[#allocation10 + $0x103]]  ;;  %s1421_s22 = sld [smem:[#allocation10 + $0x184]] }
  0x84   :  { %v314_v39 = vadd.f32 %v1229_v43, %v310_v28  ;;  %v383_v40 = vmul.f32 %v382_v34, %v983_v1  ;;  %v386_v42 = vstv %s1263_s25  ;;  %v390_v41 = vstv %s1265_s26  ;;  %s1394_s25 = sld [smem:[#allocation12 + $0x1]]  ;;  %s1396_s26 = sld [smem:[#allocation10 + $0x104]] }
  0x85   :  { %v349_v44 = vadd.f32 %v348_v6, %v345_v32  ;;  %v1317_v45 = vmul.f32 %v371_v30, %v1040_v25  ;;  %v387_v0 = vmul.f32 %v386_v42, %v989_v2  ;;  %v394_v47 = vstv %s1270_s28  ;;  %s1400_s28 = sld [smem:[#allocation10 + $0x105]] }
  0x86   :  { %v318_v1 = vadd.f32 %v1232_v36, %v314_v39  ;;  %v384_v43 = vadd.f32 %v383_v40, %v380_v35  ;;  %v391_v37 = vmul.f32 %v390_v41, %v995_v4  ;;  %v398_v48 = vstv %s1275_s29  ;;  %s1402_s29 = sld [smem:[#allocation10 + $0x180]] }
  0x87   :  { %v353_v49 = vadd.f32 %v352_v18, %v349_v44  ;;  %v395_v50 = vmul.f32 %v394_v47, %v1002_v7  ;;  %v402_v2 = vstv %s1281_s0  ;;  %v406_v52 = vstv %s1283_s30  ;;  %s1409_s0 = sld [smem:[#allocation10 + $0x181]]  ;;  %s1411_s30 = sld [smem:[#allocation10 + $0x182]] }
  0x88   :  { %v322_v55 = vadd.f32 %v1259_v57, %v318_v1  ;;  %v388_v36 = vadd.f32 %v387_v0, %v384_v43  ;;  %v399_v38 = vmul.f32 %v398_v48, %v1009_v10  ;;  %v403_v4 = vmul.f32 %v402_v2, %v1011_v11 }
  0x89   :  { %v357_v53 = vadd.f32 %v356_v22, %v353_v49  ;;  %v410_v56 = vstv %s1288_s24  ;;  %v414_v7 = vstv %s1294_s2  ;;  %v418_v59 = vstv %s1296_s8  ;;  %s1415_s24 = sld [smem:[#allocation10 + $0x183]]  ;;  %s1423_s2 = sld [smem:[#allocation10 + $0x185]] }
  0x8a   :  { %v325_v57 = vadd.f32 %v324_v46, %v322_v55  ;;  %v392_v10 = vadd.f32 %v391_v37, %v388_v36  ;;  %v407_v11 = vmul.f32 %v406_v52, %v1018_v14  ;;  %v411_v60 = vmul.f32 %v410_v56, %v1020_v15  ;;  %s1427_s8 = sld [smem:[#allocation12 + $0x2]] }
  0x8b   :  { %v361_v54 = vadd.f32 %v360_v27, %v357_v53  ;;  %v415_v61 = vmul.f32 %v414_v7, %v1029_v20  ;;  %v1357_v63 = vmul.f32 %v418_v59, %v1031_v21  ;;  %v422_v3 = vstv %s1306_s9  ;;  %s1433_s9 = sld [smem:[#allocation10 + $0x200]] }
  0x8c   :  { %v1364_v46 = vmax.f32 %v325_v57, 0.0  ;;  %v396_v14 = vadd.f32 %v395_v50, %v392_v10  ;;  %v426_v5 = vstv %s1312_s10  ;;  %v430_v15 = vstv %s1314_s11  ;;  %s1435_s11 = sld [smem:[#allocation10 + $0x201]]  ;;  %s1472_s10 = sld [smem:[#allocation10 + $0x280]] }
  0x8d   :  { %v365_v8 = vadd.f32 %v364_v13, %v361_v54  ;;  %v431_v20 = vmul.f32 %v430_v15, %v1192_v51  ;;  %v433_v62 = vstv %s1321_s3  ;;  %v437_v21 = vstv %s1323_s12  ;;  %s1442_s3 = sld [smem:[#allocation10 + $0x202]]  ;;  %s1449_s12 = sld [smem:[#allocation10 + $0x203]] }
  0x8e   :  { %v400_v16 = vadd.f32 %v399_v38, %v396_v14  ;;  %v434_v17 = vmul.f32 %v433_v62, %v1239_v12  ;;  %v438_v9 = vmul.f32 %v437_v21, %v1290_v58  ;;  %v441_v6 = vstv %s1328_s13  ;;  %s1451_s13 = sld [smem:[#allocation10 + $0x204]] }
  0x8f   :  { %v369_v18 = vadd.f32 %v1299_v29, %v365_v8  ;;  %v423_v19 = vmul.f32 %v422_v3, %v1040_v25  ;;  %v442_v22 = vmul.f32 %v441_v6, %v1364_v46  ;;  %v445_v23 = vstv %s1333_s14  ;;  %s1457_s14 = sld [smem:[#allocation12 + $0x3]] }
  0x90   :  { %v404_v24 = vadd.f32 %v403_v4, %v400_v16  ;;  %v435_v26 = vadd.f32 %v434_v17, %v431_v20  ;;  %v449_v27 = vstv %s1338_s15  ;;  %v457_v13 = vstv %s1340_s4  ;;  %s1463_s4 = sld [smem:[#allocation10 + $0x205]]  ;;  %s1487_s15 = sld [smem:[#allocation10 + $0x283]] }
  0x91   :  { %v373_v28 = vadd.f32 %v1317_v45, %v369_v18  ;;  %v458_v29 = vmul.f32 %v457_v13, %v1192_v51  ;;  %v460_v25 = vstv %s1345_s5  ;;  %v464_v30 = vstv %s1347_s16  ;;  %s1479_s5 = sld [smem:[#allocation10 + $0x281]]  ;;  %s1481_s16 = sld [smem:[#allocation10 + $0x282]] }
  0x92   :  { %v408_v31 = vadd.f32 %v407_v11, %v404_v24  ;;  %v439_v32 = vadd.f32 %v438_v9, %v435_v26  ;;  %v461_v35 = vmul.f32 %v460_v25, %v1239_v12  ;;  %v465_v34 = vmul.f32 %v464_v30, %v1290_v58 }
  0x93   :  { %v376_v39 = vadd.f32 %v375_v33, %v373_v28  ;;  %v453_v40 = vstv %s1353_s17  ;;  %v468_v42 = vstv %s1360_s18  ;;  %v472_v41 = vstv %s1362_s27  ;;  %s1489_s18 = sld [smem:[#allocation12 + $0x4]]  ;;  %s1510_s17 = sld [smem:[#allocation13 + $0x3]] }
  0x94   :  { %v412_v44 = vadd.f32 %v411_v60, %v408_v31  ;;  %v462_v45 = vadd.f32 %v461_v35, %v458_v29  ;;  %v469_v0 = vmul.f32 %v468_v42, %v1364_v46  ;;  %v476_v47 = vstv %s1368_s19  ;;  %s1491_s27 = sld [smem:[#allocation10 + $0x284]]  ;;  %s1496_s19 = sld [smem:[#allocation10 + $0x285]] }
  0x95   :  { %v1417_v1 = vmax.f32 %v376_v39, 0.0  ;;  %v443_v43 = vadd.f32 %v442_v22, %v439_v32  ;;  %v484_v33 = vstv %s1373_s1  ;;  %v487_v37 = vstv %s1375_s20  ;;  %s1498_s1 = sld [smem:[#allocation13]]  ;;  %s1503_s20 = sld [smem:[#allocation13 + $0x1]] }
  0x96   :  { %v416_v48 = vadd.f32 %v415_v61, %v412_v44  ;;  %v466_v49 = vadd.f32 %v465_v34, %v462_v45  ;;  %v485_v50 = vmul.f32 %v484_v33, %v1192_v51  ;;  %v488_v2 = vmul.f32 %v487_v37, %v1239_v12 }
  0x97   :  { %v446_v52 = vmul.f32 %v445_v23, %v1417_v1  ;;  %v473_v55 = vmul.f32 %v472_v41, %v1417_v1  ;;  %v491_v36 = vstv %s1384_s21  ;;  %v495_v38 = vstv %s1386_s23  ;;  %s1505_s21 = sld [smem:[#allocation13 + $0x2]]  ;;  %s1517_s23 = sld [smem:[#allocation13 + $0x4]] }
  0x98   :  { %v420_v4 = vadd.f32 %v1357_v63, %v416_v48  ;;  %v470_v53 = vadd.f32 %v469_v0, %v466_v49  ;;  %v489_v56 = vadd.f32 %v488_v2, %v485_v50  ;;  %v492_v7 = vmul.f32 %v491_v36, %v1290_v58 }
  0x99   :  { %v447_v59 = vadd.f32 %v446_v52, %v443_v43  ;;  %v480_v57 = vstv %s1394_s25  ;;  %v496_v10 = vmul.f32 %v495_v38, %v1364_v46  ;;  %v499_v11 = vstv %s1396_s26  ;;  %s758_s25 = sld [smem:[#allocation12 + $0x5]] }
  0x9a   :  { %v424_v60 = vadd.f32 %v423_v19, %v420_v4  ;;  %v493_v54 = vadd.f32 %v492_v7, %v489_v56  ;;  %v500_v61 = vmul.f32 %v499_v11, %v1417_v1  ;;  %v503_v63 = vstv %s1400_s28  ;;  %s763_s26 = sld [smem:[#allocation13 + $0x5]] }
  0x9b   :  { %v474_v3 = vadd.f32 %v473_v55, %v470_v53  ;;  %v511_v14 = vstv %s1402_s29  ;;  %v514_v15 = vstv %s1409_s0  ;;  %v518_v8 = vstv %s1411_s30  ;;  %s900_s0 = smov [#allocation15]  }
  0x9c   :  { %v427_v20 = vadd.f32 %v426_v5, %v424_v60  ;;  %v497_v62 = vadd.f32 %v496_v10, %v493_v54  ;;  %v512_v21 = vmul.f32 %v511_v14, %v1192_v51  ;;  %v515_v16 = vmul.f32 %v514_v15, %v1239_v12  ;;  %s630_s30 = sshll.u32 %s900_s0, 4  ;;  %s631_s30 = int_to_ptr.vmem [resolvable:$true] %s630_s30 }
  0x9d   :  { %v519_v17 = vmul.f32 %v518_v8, %v1290_v58  ;;  %v522_v9 = vstv %s1415_s24  ;;  %v526_v6 = vstv %s1421_s22  ;;  %v530_v18 = vstv %s1423_s2  ;;  %s858_s24 = scalar_lea.vmem %s631_s30, 128  ;;  %p863_p4 = scmp.lt.s32.totalorder %s631_s30, %s631_s30 }
  0x9e   :  { %v1465_v19 = vmax.f32 %v427_v20, 0.0  ;;  %v501_v5 = vadd.f32 %v500_v61, %v497_v62  ;;  %v516_v22 = vadd.f32 %v515_v16, %v512_v21  ;;  %v523_v23 = vmul.f32 %v522_v9, %v1364_v46  ;;  %p859_p3 = scmp.ne.s32.totalorder %s631_s30, %s858_s24  ;;  %p864_p5 = scmp.lt.s32.totalorder %s858_s24, %s858_s24 }
  0x9f   :  { %v507_v24 = vstv %s1427_s8  ;;  %v527_v26 = vmul.f32 %v526_v6, %v1417_v1  ;;  %v538_v13 = vstv %s1433_s9  ;;  %v541_v28 = vstv %s1435_s11 }
  0xa0   :  { %v450_v29 = vmul.f32 %v449_v27, %v1465_v19  ;;  %v477_v25 = vmul.f32 %v476_v47, %v1465_v19  ;;  %v504_v30 = vmul.f32 %v503_v63, %v1465_v19  ;;  %v520_v31 = vadd.f32 %v519_v17, %v516_v22  ;;  %p865_p6 = por %p864_p5, %p863_p4 }
  0xa1   :  { %v531_v32 = vmul.f32 %v530_v18, %v1465_v19  ;;  %v539_v35 = vmul.f32 %v538_v13, %v1192_v51  ;;  %v542_v34 = vmul.f32 %v541_v28, %v1239_v12  ;;  %v545_v39 = vstv %s1442_s3 }
  0xa2   :  { %v451_v27 = vadd.f32 %v450_v29, %v447_v59  ;;  %v478_v42 = vadd.f32 %v477_v25, %v474_v3  ;;  %v505_v41 = vadd.f32 %v504_v30, %v501_v5  ;;  %v524_v44 = vadd.f32 %v523_v23, %v520_v31  ;;  %p866_p7 = pnand %p865_p6, %p859_p3 }
  0xa3   :  { %v543_v45 = vadd.f32 %v542_v34, %v539_v35  ;;  %v546_v0 = vmul.f32 %v545_v39, %v1290_v58  ;;  %v549_v47 = vstv %s1449_s12  ;;  %v553_v43 = vstv %s1451_s13 }
  0xa4   :  { %v454_v33 = vadd.f32 %v453_v40, %v451_v27  ;;  %v481_v37 = vadd.f32 %v480_v57, %v478_v42  ;;  %v528_v48 = vadd.f32 %v527_v26, %v524_v44  ;;  %v534_v49 = vstv %s1457_s14 }
  0xa5   :  { %v547_v50 = vadd.f32 %v546_v0, %v543_v45  ;;  %v550_v2 = vmul.f32 %v549_v47, %v1364_v46  ;;  %v554_v52 = vmul.f32 %v553_v43, %v1417_v1  ;;  %v557_v55 = vstv %s1463_s4 }
  0xa6   :  { %v455_v36 = vmax.f32 %v454_v33, 0.0  ;;  %v508_v38 = vadd.f32 %v507_v24, %v505_v41  ;;  %v532_v40 = vadd.f32 %v531_v32, %v528_v48  ;;  %v482_v4 = vmax.f32 %v481_v37, 0.0 }
  0xa7   :  { %v551_v53 = vadd.f32 %v550_v2, %v547_v50  ;;  %v558_v56 = vmul.f32 %v557_v55, %v1465_v19  ;;  %v565_v7 = vstv %s1472_s10  ;;  %v568_v10 = vstv %s1479_s5 }
  0xa8   :  { %v535_v59 = vadd.f32 %v534_v49, %v532_v40  ;;  %v566_v57 = vmul.f32 %v565_v7, %v1192_v51  ;;  %v572_v11 = vstv %s1481_s16  ;;  %v569_v54 = vmul.f32 %v568_v10, %v1239_v12 }
  0xa9   :  { %v555_v60 = vadd.f32 %v554_v52, %v551_v53  ;;  %v573_v61 = vmul.f32 %v572_v11, %v1290_v58  ;;  %v576_v63 = vstv %s1487_s15  ;;  %v509_v3 = vmax.f32 %v508_v38, 0.0 }
  0xaa   :  { %v536_v14 = vmax.f32 %v535_v59, 0.0  ;;  %v561_v15 = vstv %s1489_s18  ;;  %v580_v8 = vstv %s1491_s27  ;;  %v570_v20 = vadd.f32 %v569_v54, %v566_v57 }
  0xab   :  { %v559_v51 = vadd.f32 %v558_v56, %v555_v60  ;;  %v577_v62 = vmul.f32 %v576_v63, %v1364_v46  ;;  %v584_v21 = vstv %s1496_s19  ;;  %v581_v16 = vmul.f32 %v580_v8, %v1417_v1 }
  0xac   :  { %v592_v17 = vstv %s1498_s1  ;;  %v595_v9 = vstv %s1503_s20  ;;  %v599_v12 = vstv %s1505_s21  ;;  %v574_v58 = vadd.f32 %v573_v61, %v570_v20 }
  0xad   :  { %v562_v6 = vadd.f32 %v561_v15, %v559_v51  ;;  %v593_v18 = vmul.f32 %v592_v17, %v455_v36  ;;  %v596_v5 = vmul.f32 %v595_v9, %v482_v4  ;;  %v585_v22 = vmul.f32 %v584_v21, %v1465_v19 }
  0xae   :  { %v600_v23 = vmul.f32 %v599_v12, %v509_v3  ;;  %v603_v24 = vstv %s1510_s17  ;;  %v578_v13 = vadd.f32 %v577_v62, %v574_v58  ;;  %v607_v29 = vstv %s1517_s23 }
  0xaf   :  { %v563_v26 = vmax.f32 %v562_v6, 0.0  ;;  %v597_v28 = vadd.f32 %v596_v5, %v593_v18  ;;  %v604_v46 = vmul.f32 %v603_v24, %v536_v14  ;;  %v588_v30 = vstv %s758_s25 }
  0xb0   :  { %v582_v25 = vadd.f32 %v581_v16, %v578_v13  ;;  %v611_v39 = vstv %s763_s26  ;;  %v615_v19 = vstv %s1554_s6 }
  0xb1   :  { %v601_v1 = vadd.f32 %v600_v23, %v597_v28  ;;  %v608_v35 = vmul.f32 %v607_v29, %v563_v26 }
  0xb2   :  { %v586_v31 = vadd.f32 %v585_v22, %v582_v25 }
  0xb3   :  { %v605_v32 = vadd.f32 %v604_v46, %v601_v1 }
  0xb4   :  { %v589_v34 = vadd.f32 %v588_v30, %v586_v31 }
  0xb5   :  { %v609_v42 = vadd.f32 %v608_v35, %v605_v32 }
  0xb6   :  { %v590_v27 = vmax.f32 %v589_v34, 0.0 }
  0xb8   :  { %v612_v41 = vmul.f32 %v611_v39, %v590_v27 }
  0xba   :  { %v613_v44 = vadd.f32 %v612_v41, %v609_v42 }
  0xbc   :  { %v616_v45 = vadd.f32 %v615_v19, %v613_v44 }
  0xbe   :  { %v764_v0 = vmul.f32 -1.442695, %v616_v45 }
  0xc0   :  { %774 = vpow2.f32 %v764_v0 }
  0xca   :  { %v775_v47 = vpop.eup %774 }
  0xcb   :  { %v620_v43 = vadd.f32 1.0, %v775_v47 }
  0xcd   :  { %776 = vrcp.f32 %v620_v43 }
  0xd7   :  { %v777_v33 = vpop.eup %776 }
  0xd8   :  { %623 = vst [vmem:[#allocation15] sm:$0xff] %v777_v33 }
  0xd9   :  { %869 = shalt.err (!%p866_p7)
}
  0xda   :  { %s870_s2 = scalar_lea.hbm %s1555_s7, 128 }
  0xdb   :  { %p871_p8 = scmp.ne.s32.totalorder %s1555_s7, %s870_s2  ;;  %p874_p9 = scmp.lt.u32.totalorder %s870_s2, %s1555_s7 }
  0xdd   :  { %p876_p10 = pnand %p874_p9, %p871_p8 }
  0xdf   :  { %879 = shalt.err (!%p876_p10)
}
  0xe0   :  { %633 = dma.vmem_to_hbm [thread:$0]  %s631_s30, 128, %s1555_s7, [#allocation5]  }
  0xe1   :  { %890 = dma.done.wait [#allocation5], 128  }
  0xe2   :  { %891 = vsyncadd [#allocation5], 4294967168 }
  0xe3   :  { %637 = vsyncpa [#allocation4], 1 }
  0xe4   :  { %638 = vsyncpa [#allocation5], 1 }
  0xe5   :  { %639 = vsyncpa [#allocation6], 1 }
  0xe6   :  { %640 = vsyncpa [#allocation7], 1 }
  0xe7   :  { %641 = vsyncpa [#allocation11], 1 }
  0xe8   :  { %642 = vsyncpa [#allocation14], 1 }

</bundles_post_ra>
